<compile_context>
chip_gen: v7x
topology: tpu7x:2x2x1
jax: 0.10.0
libtpu: 0.0.40
codegen_flags: <defaults>
</compile_context>

<pallas_src>
from functools import partial

import jax
import jax.numpy as jnp
from jax.experimental import pallas as pl
from jax.experimental.pallas import tpu as pltpu


def _round_up(x, m):
    return (x + m - 1) // m * m


def _conv_taps(x, w_ref, *, H, W, Cpad):
    """3x3 conv as 9 accumulating MXU matmuls.

    x     : (Hp*Wp, Cin) bf16 — one zero-padded image flattened row-major,
            Hp = H + 3 (1 top / 2 bottom pad rows), Wp = W + 2 (1 left/right).
    w_ref : (9, Cin, Cpad) bf16 ref, tap-major (dy*3 + dx).
    return: (H*Wp, Cpad) f32 conv output over the padded width; columns
            W, W+1 of each output row are garbage (discarded by the caller).
    """
    Wp = W + 2
    M = H * Wp
    acc = jnp.zeros((M, Cpad), jnp.float32)
    for dy in range(3):
        for dx in range(3):
            off = dy * Wp + dx                      # static sublane offset
            acc = acc + jnp.dot(x[off:off + M, :], w_ref[dy * 3 + dx],
                                preferred_element_type=jnp.float32)
    return acc


def _stats_kernel(x_ref, w_ref, mask_ref, sum_ref, sq_ref, *, H, W, Cpad):
    """Pass 1: conv + per-channel sum / sum-of-squares over valid pixels."""
    @pl.when(pl.program_id(0) == 0)
    def _():
        sum_ref[...] = jnp.zeros_like(sum_ref)
        sq_ref[...] = jnp.zeros_like(sq_ref)

    y = _conv_taps(x_ref[0], w_ref, H=H, W=W, Cpad=Cpad)   # (H*Wp, Cpad) f32
    yv = y * mask_ref[...]                                  # zero the 2 garbage cols/row
    sum_ref[...] += jnp.sum(yv, axis=0, keepdims=True)
    sq_ref[...] += jnp.sum(yv * yv, axis=0, keepdims=True)


def _norm_kernel(x_ref, w_ref, scale_ref, shift_ref, o_ref, *, H, W, Cpad):
    """Pass 2: recompute conv, apply folded BN scale/shift, ReLU, dense store."""
    y = _conv_taps(x_ref[0], w_ref, H=H, W=W, Cpad=Cpad)
    z = y * scale_ref[...] + shift_ref[...]
    o_ref[0] = jnp.maximum(z, 0.0).astype(o_ref.dtype)


def conv_forward(x_nchw, weight, bias, gamma, beta, eps=1e-5):
    """Forward pass of the PyTorch `Conv` block.

    x_nchw : (N, Cin, H, W)    float32
    weight : (Cout, Cin, 3, 3) float32 (PyTorch Conv2d layout)
    bias   : (Cout,)  -- unused: cancels exactly under training-mode BatchNorm
    gamma  : (Cout,)  BN weight
    beta   : (Cout,)  BN bias
    returns: (N, Cout, H, W)
    """
    del bias  # exact no-op under training-mode BN (removed by mean subtraction)

    N, Cin, H, W = x_nchw.shape
    Cout = weight.shape[0]
    Wp, Hp = W + 2, H + 3
    Mrow = H * Wp                       # output rows per image (padded-width layout)
    Cpad = _round_up(Cout, 128)         # lane-dense matmul N dim / stores

    # ---- glue: NCHW -> NHWC, zero-pad spatial, flatten, bf16 MXU operands ----
    x_nhwc = jnp.transpose(x_nchw, (0, 2, 3, 1))
    xp = jnp.pad(x_nhwc, ((0, 0), (1, 2), (1, 1), (0, 0)))     # (N, Hp, Wp, Cin)
    x_flat = xp.reshape(N, Hp * Wp, Cin).astype(jnp.bfloat16)

    # weight (Cout, Cin, 3, 3) -> (3, 3, Cin, Cout) -> (9, Cin, Cpad), bf16
    w9 = jnp.transpose(weight, (2, 3, 1, 0)).reshape(9, Cin, Cout)
    w9 = jnp.pad(w9, ((0, 0), (0, 0), (0, Cpad - Cout))).astype(jnp.bfloat16)

    # validity mask over the padded-width output layout (cols W, W+1 are garbage)
    col_mask = jnp.tile((jnp.arange(Wp) < W).astype(jnp.float32), H).reshape(Mrow, 1)

    x_spec = pl.BlockSpec((1, Hp * Wp, Cin), lambda n: (n, 0, 0))
    w_spec = pl.BlockSpec((9, Cin, Cpad), lambda n: (0, 0, 0))
    vec_spec = pl.BlockSpec((1, Cpad), lambda n: (0, 0))

    flops = 2 * N * Mrow * 9 * Cin * Cpad
    x_bytes = N * Hp * Wp * Cin * 2
    w_bytes = 9 * Cin * Cpad * 2
    cparams = dict(vmem_limit_bytes=64 * 1024 * 1024)

    # ---- pass 1: conv + per-channel sum / sum-of-squares (accumulated over N) ----
    sums, sqs = pl.pallas_call(
        partial(_stats_kernel, H=H, W=W, Cpad=Cpad),
        grid=(N,),
        in_specs=[x_spec, w_spec, pl.BlockSpec((Mrow, 1), lambda n: (0, 0))],
        out_specs=[vec_spec, vec_spec],
        out_shape=[jax.ShapeDtypeStruct((1, Cpad), jnp.float32),
                   jax.ShapeDtypeStruct((1, Cpad), jnp.float32)],
        compiler_params=pltpu.CompilerParams(
            dimension_semantics=("arbitrary",), **cparams),
        cost_estimate=pl.CostEstimate(
            flops=flops, transcendentals=0,
            bytes_accessed=x_bytes + w_bytes + Mrow * 4 + 2 * Cpad * 4),
    )(x_flat, w9, col_mask)

    # ---- tiny per-channel glue (XLA): fold BN stats into scale/shift ----
    cnt = jnp.float32(N * H * W)
    mean = sums / cnt
    var = jnp.maximum(sqs / cnt - mean * mean, 0.0)          # biased variance
    gamma_p = jnp.pad(gamma.astype(jnp.float32), (0, Cpad - Cout)).reshape(1, Cpad)
    beta_p = jnp.pad(beta.astype(jnp.float32), (0, Cpad - Cout)).reshape(1, Cpad)
    scale = gamma_p * jax.lax.rsqrt(var + eps)
    shift = beta_p - mean * scale

    # ---- pass 2: recompute conv, fused scale/shift + ReLU, lane-dense store ----
    out_flat = pl.pallas_call(
        partial(_norm_kernel, H=H, W=W, Cpad=Cpad),
        grid=(N,),
        in_specs=[x_spec, w_spec, vec_spec, vec_spec],
        out_specs=pl.BlockSpec((1, Mrow, Cpad), lambda n: (n, 0, 0)),
        out_shape=jax.ShapeDtypeStruct((N, Mrow, Cpad), x_nchw.dtype),
        compiler_params=pltpu.CompilerParams(
            dimension_semantics=("parallel",), **cparams),
        cost_estimate=pl.CostEstimate(
            flops=flops, transcendentals=0,
            bytes_accessed=x_bytes + w_bytes + 2 * Cpad * 4 + N * Mrow * Cpad * 4),
    )(x_flat, w9, scale, shift)

    # ---- glue: drop garbage columns / channel padding, back to NCHW ----
    out = out_flat.reshape(N, H, Wp, Cpad)[:, :, :W, :Cout]
    return jnp.transpose(out, (0, 3, 1, 2))


if __name__ == "__main__":
    # Small deterministic example consistent with the module:
    # Conv(in_ch=4, out_ch=8), input (N=2, C=4, H=16, W=16)
    N, Cin, Cout, H, W = 2, 4, 8, 16, 16

    key = jax.random.PRNGKey(0)
    k_x, k_w, k_b = jax.random.split(key, 3)

    x = jax.random.normal(k_x, (N, Cin, H, W), dtype=jnp.float32)

    fan_in = Cin * 3 * 3
    bound = 1.0 / (fan_in ** 0.5)
    weight = jax.random.uniform(k_w, (Cout, Cin, 3, 3), jnp.float32, -bound, bound)
    bias = jax.random.uniform(k_b, (Cout,), jnp.float32, -bound, bound)
    gamma = jnp.ones((Cout,), jnp.float32)   # BatchNorm2d default weight
    beta = jnp.zeros((Cout,), jnp.float32)   # BatchNorm2d default bias

    out = conv_forward(x, weight, bias, gamma, beta)
    jax.block_until_ready(out)
    assert out.shape == (N, Cout, H, W)

    # Pure-JAX f32 reference (loose tolerance: kernel uses bf16 MXU operands).
    y = jax.lax.conv_general_dilated(
        x, weight, (1, 1), ((1, 1), (1, 1)),
        dimension_numbers=("NCHW", "OIHW", "NCHW"))
    y = y + bias[None, :, None, None]
    mu = y.mean(axis=(0, 2, 3), keepdims=True)
    var = y.var(axis=(0, 2, 3), keepdims=True)
    ref = jnp.maximum((y - mu) * jax.lax.rsqrt(var + 1e-5)
                      * gamma[None, :, None, None] + beta[None, :, None, None], 0.0)
    assert bool(jnp.allclose(out, ref, atol=5e-2, rtol=5e-2)), \
        f"max|diff|={float(jnp.max(jnp.abs(out - ref)))}"

    print("KERNEL_OK")
</pallas_src>

<mosaic_0001>
module attributes {stable_mosaic.version = 11 : i64} {
  func.func @_stats_kernel(%arg0: i32, %arg1: memref<1x342x4xbf16, #tpu.memory_space<vmem>>, %arg2: memref<9x4x128xbf16, #tpu.memory_space<vmem>>, %arg3: memref<288x1xf32, #tpu.memory_space<vmem>>, %arg4: memref<1x128xf32, #tpu.memory_space<vmem>>, %arg5: memref<1x128xf32, #tpu.memory_space<vmem>>) attributes {dimension_semantics = [#tpu.dimension_semantics<arbitrary>], iteration_bounds = array<i64: 2>, scalar_prefetch = 0 : i64, scratch_operands = 0 : i64, tpu.core_type = #tpu.core_type<tc>, window_params = [{transform_indices = @transform_0, window_bounds = array<i64: 1, 342, 4>}, {pipeline_mode = #tpu.pipeline_mode<synchronous>, transform_indices = @transform_1, window_bounds = array<i64: 9, 4, 128>}, {pipeline_mode = #tpu.pipeline_mode<synchronous>, transform_indices = @transform_2, window_bounds = array<i64: 288, 1>}, {pipeline_mode = #tpu.pipeline_mode<synchronous>, transform_indices = @transform_3, window_bounds = array<i64: 1, 128>}, {pipeline_mode = #tpu.pipeline_mode<synchronous>, transform_indices = @transform_4, window_bounds = array<i64: 1, 128>}]} {
    %c0_i32 = arith.constant 0 : i32
    %0 = arith.cmpi eq, %arg0, %c0_i32 : i32
    %1 = arith.extui %0 : i1 to i32
    %c0_i32_0 = arith.constant 0 : i32
    %2 = arith.cmpi ne, %1, %c0_i32_0 : i32
    scf.if %2 {
      %cst_43 = arith.constant 0.000000e+00 : f32
      %65 = vector.broadcast %cst_43 : f32 to vector<1x128xf32>
      %c0_44 = arith.constant 0 : index
      %c0_45 = arith.constant 0 : index
      %66 = vector.load %arg4[%c0_44, %c0_45] : memref<1x128xf32, #tpu.memory_space<vmem>>, vector<1x128xf32>
      tpu.vector_store %arg4[%c0_44, %c0_45], %65 {strides = array<i32>} : memref<1x128xf32, #tpu.memory_space<vmem>>, vector<1x128xf32>,
      %cst_46 = arith.constant 0.000000e+00 : f32
      %67 = vector.broadcast %cst_46 : f32 to vector<1x128xf32>
      %c0_47 = arith.constant 0 : index
      %c0_48 = arith.constant 0 : index
      %68 = vector.load %arg5[%c0_47, %c0_48] : memref<1x128xf32, #tpu.memory_space<vmem>>, vector<1x128xf32>
      tpu.vector_store %arg5[%c0_47, %c0_48], %67 {strides = array<i32>} : memref<1x128xf32, #tpu.memory_space<vmem>>, vector<1x128xf32>,
    } else {
    }
    %c0 = arith.constant 0 : index
    %c0_1 = arith.constant 0 : index
    %c0_2 = arith.constant 0 : index
    %3 = vector.load %arg1[%c0, %c0_1, %c0_2] : memref<1x342x4xbf16, #tpu.memory_space<vmem>>, vector<1x342x4xbf16>
    %4 = vector.shape_cast %3 : vector<1x342x4xbf16> to vector<342x4xbf16>
    %cst = arith.constant 0.000000e+00 : f32
    %5 = vector.broadcast %cst : f32 to vector<288x128xf32>
    %6 = vector.extract_strided_slice %4 {offsets = [0, 0], sizes = [288, 4], strides = [1, 1]} : vector<342x4xbf16> to vector<288x4xbf16>
    %c0_3 = arith.constant 0 : index
    %c0_4 = arith.constant 0 : index
    %c0_5 = arith.constant 0 : index
    %7 = vector.load %arg2[%c0_3, %c0_4, %c0_5] : memref<9x4x128xbf16, #tpu.memory_space<vmem>>, vector<1x4x128xbf16>
    %8 = vector.shape_cast %7 : vector<1x4x128xbf16> to vector<4x128xbf16>
    %cst_6 = arith.constant dense<0.000000e+00> : vector<288x128xf32>
    %9 = tpu.matmul %6, %8, %cst_6 {dimension_numbers = #tpu.dot_dimension_numbers<[1], [0], [0], [1], [0, 0, 1, 1], [], []>} : vector<288x4xbf16>, vector<4x128xbf16>, vector<288x128xf32> -> vector<288x128xf32>
    %10 = arith.addf %5, %9 : vector<288x128xf32>
    %11 = vector.extract_strided_slice %4 {offsets = [1, 0], sizes = [288, 4], strides = [1, 1]} : vector<342x4xbf16> to vector<288x4xbf16>
    %c1 = arith.constant 1 : index
    %c0_7 = arith.constant 0 : index
    %c0_8 = arith.constant 0 : index
    %12 = vector.load %arg2[%c1, %c0_7, %c0_8] : memref<9x4x128xbf16, #tpu.memory_space<vmem>>, vector<1x4x128xbf16>
    %13 = vector.shape_cast %12 : vector<1x4x128xbf16> to vector<4x128xbf16>
    %cst_9 = arith.constant dense<0.000000e+00> : vector<288x128xf32>
    %14 = tpu.matmul %11, %13, %cst_9 {dimension_numbers = #tpu.dot_dimension_numbers<[1], [0], [0], [1], [0, 0, 1, 1], [], []>} : vector<288x4xbf16>, vector<4x128xbf16>, vector<288x128xf32> -> vector<288x128xf32>
    %15 = arith.addf %10, %14 : vector<288x128xf32>
    %16 = vector.extract_strided_slice %4 {offsets = [2, 0], sizes = [288, 4], strides = [1, 1]} : vector<342x4xbf16> to vector<288x4xbf16>
    %c2 = arith.constant 2 : index
    %c0_10 = arith.constant 0 : index
    %c0_11 = arith.constant 0 : index
    %17 = vector.load %arg2[%c2, %c0_10, %c0_11] : memref<9x4x128xbf16, #tpu.memory_space<vmem>>, vector<1x4x128xbf16>
    %18 = vector.shape_cast %17 : vector<1x4x128xbf16> to vector<4x128xbf16>
    %cst_12 = arith.constant dense<0.000000e+00> : vector<288x128xf32>
    %19 = tpu.matmul %16, %18, %cst_12 {dimension_numbers = #tpu.dot_dimension_numbers<[1], [0], [0], [1], [0, 0, 1, 1], [], []>} : vector<288x4xbf16>, vector<4x128xbf16>, vector<288x128xf32> -> vector<288x128xf32>
    %20 = arith.addf %15, %19 : vector<288x128xf32>
    %21 = vector.extract_strided_slice %4 {offsets = [18, 0], sizes = [288, 4], strides = [1, 1]} : vector<342x4xbf16> to vector<288x4xbf16>
    %c3 = arith.constant 3 : index
    %c0_13 = arith.constant 0 : index
    %c0_14 = arith.constant 0 : index
    %22 = vector.load %arg2[%c3, %c0_13, %c0_14] : memref<9x4x128xbf16, #tpu.memory_space<vmem>>, vector<1x4x128xbf16>
    %23 = vector.shape_cast %22 : vector<1x4x128xbf16> to vector<4x128xbf16>
    %cst_15 = arith.constant dense<0.000000e+00> : vector<288x128xf32>
    %24 = tpu.matmul %21, %23, %cst_15 {dimension_numbers = #tpu.dot_dimension_numbers<[1], [0], [0], [1], [0, 0, 1, 1], [], []>} : vector<288x4xbf16>, vector<4x128xbf16>, vector<288x128xf32> -> vector<288x128xf32>
    %25 = arith.addf %20, %24 : vector<288x128xf32>
    %26 = vector.extract_strided_slice %4 {offsets = [19, 0], sizes = [288, 4], strides = [1, 1]} : vector<342x4xbf16> to vector<288x4xbf16>
    %c4 = arith.constant 4 : index
    %c0_16 = arith.constant 0 : index
    %c0_17 = arith.constant 0 : index
    %27 = vector.load %arg2[%c4, %c0_16, %c0_17] : memref<9x4x128xbf16, #tpu.memory_space<vmem>>, vector<1x4x128xbf16>
    %28 = vector.shape_cast %27 : vector<1x4x128xbf16> to vector<4x128xbf16>
    %cst_18 = arith.constant dense<0.000000e+00> : vector<288x128xf32>
    %29 = tpu.matmul %26, %28, %cst_18 {dimension_numbers = #tpu.dot_dimension_numbers<[1], [0], [0], [1], [0, 0, 1, 1], [], []>} : vector<288x4xbf16>, vector<4x128xbf16>, vector<288x128xf32> -> vector<288x128xf32>
    %30 = arith.addf %25, %29 : vector<288x128xf32>
    %31 = vector.extract_strided_slice %4 {offsets = [20, 0], sizes = [288, 4], strides = [1, 1]} : vector<342x4xbf16> to vector<288x4xbf16>
    %c5 = arith.constant 5 : index
    %c0_19 = arith.constant 0 : index
    %c0_20 = arith.constant 0 : index
    %32 = vector.load %arg2[%c5, %c0_19, %c0_20] : memref<9x4x128xbf16, #tpu.memory_space<vmem>>, vector<1x4x128xbf16>
    %33 = vector.shape_cast %32 : vector<1x4x128xbf16> to vector<4x128xbf16>
    %cst_21 = arith.constant dense<0.000000e+00> : vector<288x128xf32>
    %34 = tpu.matmul %31, %33, %cst_21 {dimension_numbers = #tpu.dot_dimension_numbers<[1], [0], [0], [1], [0, 0, 1, 1], [], []>} : vector<288x4xbf16>, vector<4x128xbf16>, vector<288x128xf32> -> vector<288x128xf32>
    %35 = arith.addf %30, %34 : vector<288x128xf32>
    %36 = vector.extract_strided_slice %4 {offsets = [36, 0], sizes = [288, 4], strides = [1, 1]} : vector<342x4xbf16> to vector<288x4xbf16>
    %c6 = arith.constant 6 : index
    %c0_22 = arith.constant 0 : index
    %c0_23 = arith.constant 0 : index
    %37 = vector.load %arg2[%c6, %c0_22, %c0_23] : memref<9x4x128xbf16, #tpu.memory_space<vmem>>, vector<1x4x128xbf16>
    %38 = vector.shape_cast %37 : vector<1x4x128xbf16> to vector<4x128xbf16>
    %cst_24 = arith.constant dense<0.000000e+00> : vector<288x128xf32>
    %39 = tpu.matmul %36, %38, %cst_24 {dimension_numbers = #tpu.dot_dimension_numbers<[1], [0], [0], [1], [0, 0, 1, 1], [], []>} : vector<288x4xbf16>, vector<4x128xbf16>, vector<288x128xf32> -> vector<288x128xf32>
    %40 = arith.addf %35, %39 : vector<288x128xf32>
    %41 = vector.extract_strided_slice %4 {offsets = [37, 0], sizes = [288, 4], strides = [1, 1]} : vector<342x4xbf16> to vector<288x4xbf16>
    %c7 = arith.constant 7 : index
    %c0_25 = arith.constant 0 : index
    %c0_26 = arith.constant 0 : index
    %42 = vector.load %arg2[%c7, %c0_25, %c0_26] : memref<9x4x128xbf16, #tpu.memory_space<vmem>>, vector<1x4x128xbf16>
    %43 = vector.shape_cast %42 : vector<1x4x128xbf16> to vector<4x128xbf16>
    %cst_27 = arith.constant dense<0.000000e+00> : vector<288x128xf32>
    %44 = tpu.matmul %41, %43, %cst_27 {dimension_numbers = #tpu.dot_dimension_numbers<[1], [0], [0], [1], [0, 0, 1, 1], [], []>} : vector<288x4xbf16>, vector<4x128xbf16>, vector<288x128xf32> -> vector<288x128xf32>
    %45 = arith.addf %40, %44 : vector<288x128xf32>
    %46 = vector.extract_strided_slice %4 {offsets = [38, 0], sizes = [288, 4], strides = [1, 1]} : vector<342x4xbf16> to vector<288x4xbf16>
    %c8 = arith.constant 8 : index
    %c0_28 = arith.constant 0 : index
    %c0_29 = arith.constant 0 : index
    %47 = vector.load %arg2[%c8, %c0_28, %c0_29] : memref<9x4x128xbf16, #tpu.memory_space<vmem>>, vector<1x4x128xbf16>
    %48 = vector.shape_cast %47 : vector<1x4x128xbf16> to vector<4x128xbf16>
    %cst_30 = arith.constant dense<0.000000e+00> : vector<288x128xf32>
    %49 = tpu.matmul %46, %48, %cst_30 {dimension_numbers = #tpu.dot_dimension_numbers<[1], [0], [0], [1], [0, 0, 1, 1], [], []>} : vector<288x4xbf16>, vector<4x128xbf16>, vector<288x128xf32> -> vector<288x128xf32>
    %50 = arith.addf %45, %49 : vector<288x128xf32>
    %c0_31 = arith.constant 0 : index
    %c0_32 = arith.constant 0 : index
    %51 = vector.load %arg3[%c0_31, %c0_32] : memref<288x1xf32, #tpu.memory_space<vmem>>, vector<288x1xf32>
    %52 = vector.broadcast %51 : vector<288x1xf32> to vector<288x128xf32>
    %53 = arith.mulf %50, %52 : vector<288x128xf32>
    %c0_33 = arith.constant 0 : index
    %c0_34 = arith.constant 0 : index
    %54 = vector.load %arg4[%c0_33, %c0_34] : memref<1x128xf32, #tpu.memory_space<vmem>>, vector<1x128xf32>
    %cst_35 = arith.constant dense<0.000000e+00> : vector<128xf32>
    %55 = vector.multi_reduction <add>, %53, %cst_35 [0] : vector<288x128xf32> to vector<128xf32>
    %56 = vector.shape_cast %55 : vector<128xf32> to vector<1x128xf32>
    %57 = arith.addf %54, %56 : vector<1x128xf32>
    %c0_36 = arith.constant 0 : index
    %c0_37 = arith.constant 0 : index
    %58 = vector.load %arg4[%c0_36, %c0_37] : memref<1x128xf32, #tpu.memory_space<vmem>>, vector<1x128xf32>
    tpu.vector_store %arg4[%c0_36, %c0_37], %57 {strides = array<i32>} : memref<1x128xf32, #tpu.memory_space<vmem>>, vector<1x128xf32>,
    %c0_38 = arith.constant 0 : index
    %c0_39 = arith.constant 0 : index
    %59 = vector.load %arg5[%c0_38, %c0_39] : memref<1x128xf32, #tpu.memory_space<vmem>>, vector<1x128xf32>
    %60 = arith.mulf %53, %53 : vector<288x128xf32>
    %cst_40 = arith.constant dense<0.000000e+00> : vector<128xf32>
    %61 = vector.multi_reduction <add>, %60, %cst_40 [0] : vector<288x128xf32> to vector<128xf32>
    %62 = vector.shape_cast %61 : vector<128xf32> to vector<1x128xf32>
    %63 = arith.addf %59, %62 : vector<1x128xf32>
    %c0_41 = arith.constant 0 : index
    %c0_42 = arith.constant 0 : index
    %64 = vector.load %arg5[%c0_41, %c0_42] : memref<1x128xf32, #tpu.memory_space<vmem>>, vector<1x128xf32>
    tpu.vector_store %arg5[%c0_41, %c0_42], %63 {strides = array<i32>} : memref<1x128xf32, #tpu.memory_space<vmem>>, vector<1x128xf32>,
    return
  }
  func.func @transform_0(%arg0: i32) -> (i32, i32, i32) {
    %c0_i32 = arith.constant 0 : i32
    %c0_i32_0 = arith.constant 0 : i32
    %c0_i32_1 = arith.constant 0 : i32
    return %arg0, %c0_i32, %c0_i32_0 : i32, i32, i32
  }
  func.func @transform_1(%arg0: i32) -> (i32, i32, i32) {
    %c0_i32 = arith.constant 0 : i32
    %c0_i32_0 = arith.constant 0 : i32
    %c0_i32_1 = arith.constant 0 : i32
    %c0_i32_2 = arith.constant 0 : i32
    return %c0_i32, %c0_i32_0, %c0_i32_1 : i32, i32, i32
  }
  func.func @transform_2(%arg0: i32) -> (i32, i32) {
    %c0_i32 = arith.constant 0 : i32
    %c0_i32_0 = arith.constant 0 : i32
    %c0_i32_1 = arith.constant 0 : i32
    return %c0_i32, %c0_i32_0 : i32, i32
  }
  func.func @transform_3(%arg0: i32) -> (i32, i32) {
    %c0_i32 = arith.constant 0 : i32
    %c0_i32_0 = arith.constant 0 : i32
    %c0_i32_1 = arith.constant 0 : i32
    return %c0_i32, %c0_i32_0 : i32, i32
  }
  func.func @transform_4(%arg0: i32) -> (i32, i32) {
    %c0_i32 = arith.constant 0 : i32
    %c0_i32_0 = arith.constant 0 : i32
    %c0_i32_1 = arith.constant 0 : i32
    return %c0_i32, %c0_i32_0 : i32, i32
  }
}

</mosaic_0001>

<bundles_post_ra>
// kernel: tpu_custom_call.1
= control target key start
LH: loop header
LB: loop body
LE: loop exit
PB: predicated region body
PF: predicated region fallthrough
CT: control target
= control target key end

     0   :  { %10 = vsyncpa [#allocation3], 0  ;;  %s6090_s0 = inlined_call_operand.hbm [shape: bf16[2,342,4], index: 0, kind: input, shape index: {}]   ;;  %s6091_s1 = inlined_call_operand.hbm [shape: bf16[9,4,128], index: 1, kind: input, shape index: {}]   ;;  %s6092_s2 = inlined_call_operand.hbm [shape: f32[288,1], index: 2, kind: input, shape index: {}]   ;;  %s6093_s3 = inlined_call_operand.hbm [shape: f32[1,128], index: 3, kind: output, shape index: {0}]   ;;  %s6094_s4 = inlined_call_operand.hbm [shape: f32[1,128], index: 4, kind: output, shape index: {1}]  }
   0x1   :  { %12 = vsyncpa [#allocation3 + $0x1], 0 }
   0x2   :  { %13 = vsyncpa [#allocation6], 0 }
   0x3   :  { %14 = vsyncpa [#allocation4], 0 }
   0x4   :  { %15 = vsyncpa [#allocation10], 0  ;;  %s4922_s15 = smov 0   ;;  %s4924_s16 = smov 0  }
   0x5   :  { %s4926_s17 = smov 0   ;;  %s4928_s18 = smov 0  }
   0x6 LB: > { %s4941_s19 = sadd.s32 4294967295, %s4882_s18   ;;  %p41_p0 = scmp.ne.s32.totalorder %s4874_s16, %s4870_s15  ;;  %s4882_s18 = sphi %s4928_s18, %s6172_s18   ;;  %s4878_s17 = sphi %s4926_s17, %s6171_s17   ;;  %s4874_s16 = sphi %s4924_s16, %s6170_s16   ;;  %s4870_s15 = sphi %s4922_s15, %s6169_s15  }
   0x7   : > { %p6095_p1 = scmp.eq.s32.totalorder %s4941_s19, 0  ;;  %p3566_p2 = scmp.ge.s32.totalorder %s4882_s18, 1 }
   0x8   : > { %p136_p3 = scmp.lt.s32.totalorder %s4882_s18, 3  ;;  %s4884_s22 = smov [#allocation5]  }
   0x9   : > { %p4950_p5 = por %p6095_p1, %p41_p0  ;;  %s148_s23 = sshll.u32 %s4884_s22, 4  ;;  %s149_s23 = int_to_ptr.vmem [resolvable:$true] %s148_s23 }
   0xa   : > { %p4954_p6 = pnand %p3566_p2, %p136_p3  ;;  %s4885_s25 = smov [#allocation7]  }
   0xb   : > { %s6127_s20 = scalar_select %p4950_p5, 1, 0 }
   0xc   : > { %s6128_s21 = scalar_select %p4954_p6, 1, 0 }
   0xd   : > { %p4600_p7 = pneg %p4954_p6  ;;  %s161_s26 = sshll.u32 %s4885_s25, 4  ;;  %s4966_s26 = int_to_ptr.vmem [resolvable:$true] %s161_s26 }
   0xe   : > { %s4698_s29 = scalar_lea.hbm %s6091_s1, 288 }
   0xf   : > { %p4962_p8 = pnand %p4600_p7, %p6095_p1  ;;  %p4699_p9 = scmp.ne.s32.totalorder %s6091_s1, %s4698_s29 }
  0x10   : > { %p4705_p13 = scmp.lt.u32.totalorder %s4698_s29, %s6091_s1 }
  0x11   : > { %p4700_p10 = pneg %p4962_p8 }
  0x13   : > { %p4701_p11 = pnand %p4700_p10, %p4699_p9 }
  0x15   : > { %p4702_p12 = pneg %p4701_p11 }
  0x17   : > { %p4707_p0 = pnand %p4705_p13, %p4702_p12 }
  0x19   : > { %4710 = shalt.err (!%p4707_p0)
}
  0x1a   : > { %s4711_s8 = scalar_lea.vmem %s149_s23, 288  ;;  %p4719_p4 = scmp.lt.s32.totalorder %s149_s23, %s149_s23 }
  0x1b   : > { %p4712_p2 = scmp.ne.s32.totalorder %s149_s23, %s4711_s8  ;;  %p4720_p1 = scmp.lt.s32.totalorder %s4711_s8, %s4711_s8 }
  0x1d   : > { %p4714_p3 = pnand %p4712_p2, %p4700_p10  ;;  %p4721_p5 = por %p4720_p1, %p4719_p4 }
  0x1f   : > { %p4715_p7 = pneg %p4714_p3 }
  0x21   : > { %p4722_p6 = pnand %p4721_p5, %p4715_p7 }
  0x23   : > { %4725 = shalt.err (!%p4722_p6)
}
  0x24   : > { %s4886_s9 = smov 32   ;;  %s4887_s10 = smov 2  }
  0x25   : > { %4603 = dma.hbm_to_vmem [thread:$0]  (!%p4962_p8), %s6091_s1, 288, %s149_s23, [#allocation6], %s4886_s9, %s4886_s9, %s4887_s10  }
  0x26   : > { %s4726_s15 = scalar_lea.hbm %s6092_s2, 4608 }
  0x27   : > { %p4727_p9 = scmp.ne.s32.totalorder %s6092_s2, %s4726_s15  ;;  %p4733_p5 = scmp.lt.u32.totalorder %s4726_s15, %s6092_s2 }
  0x29   : > { %p4729_p1 = pnand %p4727_p9, %p4700_p10 }
  0x2b   : > { %p4730_p4 = pneg %p4729_p1 }
  0x2d   : > { %p4735_p6 = pnand %p4733_p5, %p4730_p4 }
  0x2f   : > { %4738 = shalt.err (!%p4735_p6)
}
  0x30   : > { %s4739_s23 = scalar_lea.vmem %s4966_s26, 4608  ;;  %p4747_p0 = scmp.lt.s32.totalorder %s4966_s26, %s4966_s26 }
  0x31   : > { %p4740_p11 = scmp.ne.s32.totalorder %s4966_s26, %s4739_s23  ;;  %p4748_p2 = scmp.lt.s32.totalorder %s4739_s23, %s4739_s23 }
  0x33   : > { %p4742_p12 = pnand %p4740_p11, %p4700_p10  ;;  %p4749_p3 = por %p4748_p2, %p4747_p0 }
  0x35   : > { %p4743_p13 = pneg %p4742_p12 }
  0x37   : > { %p4750_p7 = pnand %p4749_p3, %p4743_p13 }
  0x39   : > { %4753 = shalt.err (!%p4750_p7)
}
  0x3a   : > { %s4888_s29 = smov 128   ;;  %s4889_s30 = smov 8  }
  0x3b   : > { %4606 = dma.hbm_to_vmem [thread:$0]  (!%p4962_p8), %s6092_s2, 4608, %s4966_s26, [#allocation6], %s4888_s29, %s4888_s29, %s4889_s30  }
  0x3c   : > { %s5016_s7 = sadd.s32 1, %s4882_s18   ;;  %s28_s9 = sadd.s32 1, %s4878_s17 }
  0x3d   : > { %s25_s8 = ssub.s32 %s4882_s18, %s5016_s7  ;;  %p35_p9 = scmp.ne.s32.totalorder %s4878_s17, %s4874_s16 }
  0x3e   : > { %p26_p10 = scmp.eq.s32.totalorder %s25_s8, 0  ;;  %p36_p1 = scmp.eq.s32.totalorder %s4882_s18, 0 }
  0x3f   : > { %p4613_p5 = scmp.lt.s32.totalorder %s4882_s18, 2  ;;  %s175_s11 = sand.u32 1, %s4878_s17  }
  0x40   : > { %s5025_s10 = scalar_select %p26_p10, %s4878_s17, %s28_s9  }
  0x41   : > { %p37_p4 = por %p36_p1, %p35_p9  ;;  %s4580_s12 = smul.u32 2752, %s4882_s18 }
  0x42   : > { %s4579_s13 = smul.u32 172, %s175_s11  ;;  %s5041_s18 = scalar_lea.sflag [#allocation3], %s175_s11 }
  0x43   : > { %s5033_s15 = scalar_lea.hbm %s6090_s0, %s4580_s12  ;;  %p5035_p8 = pnand %p4613_p5, %p37_p4 }
  0x44   : > { %s179_s22 = scalar_lea.vmem [#allocation2], %s4579_s13  ;;  %s4754_s27 = scalar_lea.hbm %s5033_s15, 2752 }
  0x45   : > { %s186_s25 = sshll.u32 %s179_s22, 4  ;;  %p4755_p6 = scmp.ne.s32.totalorder %s5033_s15, %s4754_s27  ;;  %s5039_s25 = int_to_ptr.vmem [resolvable:$true] %s186_s25 }
  0x46   : > { %p4756_p11 = pneg %p5035_p8  ;;  %s4759_s29 = scalar_lea.hbm %s6090_s0, 5504 }
  0x47   : > { %p4760_p0 = scmp.lt.u32.totalorder %s5033_s15, %s6090_s0  ;;  %p4761_p2 = scmp.lt.u32.totalorder %s4759_s29, %s4754_s27 }
  0x48   : > { %p4757_p12 = pnand %p4756_p11, %p4755_p6  ;;  %p4763_p7 = scmp.lt.u32.totalorder %s4754_s27, %s5033_s15 }
  0x49   : > { %p4762_p3 = por %p4761_p2, %p4760_p0 }
  0x4a   : > { %p4758_p13 = pneg %p4757_p12 }
  0x4b   : > { %p4764_p10 = por %p4763_p7, %p4762_p3 }
  0x4d   : > { %p4765_p9 = pnand %p4764_p10, %p4758_p13 }
  0x4f   : > { %4768 = shalt.err (!%p4765_p9)
}
  0x50   : > { %s4769_s6 = scalar_lea.vmem %s5039_s25, 2752  ;;  %s4890_s8 = smov [#allocation2]  }
  0x51   : > { %p4770_p1 = scmp.ne.s32.totalorder %s5039_s25, %s4769_s6  ;;  %s4774_s9 = sshll.u32 %s4890_s8, 4  ;;  %s4775_s9 = int_to_ptr.vmem [resolvable:$false] %s4774_s9 }
  0x52   : > { %s4776_s11 = scalar_lea.vmem %s4775_s9, 5504  ;;  %p4777_p6 = scmp.lt.s32.totalorder %s5039_s25, %s4775_s9 }
  0x53   : > { %p4772_p4 = pnand %p4770_p1, %p4756_p11  ;;  %p4778_p12 = scmp.lt.s32.totalorder %s4776_s11, %s4769_s6 }
  0x55   : > { %p4773_p5 = pneg %p4772_p4  ;;  %p4779_p0 = por %p4778_p12, %p4777_p6 }
  0x57   : > { %p4780_p2 = pnand %p4779_p0, %p4773_p5 }
  0x59   : > { %4783 = shalt.err (!%p4780_p2)
}
  0x5a   : > { %s4891_s12 = smov 64   ;;  %s4892_s13 = smov 4  }
  0x5b   : > { %4610 = dma.hbm_to_vmem [thread:$0]  (!%p5035_p8), %s5033_s15, 2752, %s5039_s25, %s5041_s18, %s4891_s12, %s4891_s12, %s4892_s13  }
  0x5c   : > { %p6131_p11 = scmp.ne.s32.totalorder %s6128_s21, 0 }
  0x5e   : > { %198 = sbr.rel (%p6131_p11) target bundleno = 727 (0x2d7), region = 32 }
  0x65   : > { %s200_s24 = sand.u32 1, %s4874_s16   ;;  %p6132_p13 = scmp.ne.s32.totalorder %s6127_s20, 0 }
  0x66   : > { %s4581_s14 = smul.u32 172, %s200_s24  ;;  %s201_s22 = scalar_lea.sflag [#allocation3], %s200_s24 }
  0x68   : > { %s5072_s27 = scalar_lea.vmem [#allocation2], %s4581_s14 }
  0x69   : > { %4853 = dma.done.wait (%p6132_p13), %s201_s22, 2752  }
  0x6a   : > { %4855 = vsyncadd (%p6132_p13), %s201_s22, 4294964544  ;;  %p6133_p3 = scmp.eq.s32.totalorder %s4941_s19, 0 }
  0x6c   : > { %4857 = dma.done.wait (%p6133_p3), [#allocation6], 4896   ;;  %p6134_p8 = pmov %p6133_p3 }
  0x6d   : > { %p6135_p7 = scmp.ne.s32.totalorder %s4941_s19, 0 }
  0x6e   : > { %4859 = vsyncadd (%p6134_p8), [#allocation6], 4294962400  ;;  %v4893_v0 = vmov (!%p6135_p7), 0.0  }
  0x6f   : > { %236 = sbr.rel (%p6135_p7) target bundleno = 118 (0x76), region = 48  ;;  %237 = vst [vmem:[#allocation8] sm:$0x1] (!%p6135_p7), %v4893_v0  ;;  %238 = vst [vmem:[#allocation9] sm:$0x1] (!%p6135_p7), %v4893_v0 }
  0x76 PF: > { %vm580_vm0 = vcmask 1041408   ;;  %v5084_v1 = vld [vmem:[#allocation5 + $0x8] sm:$0x3]  ;;  %v282_v2 = vld [vmem:[#allocation5 + $0x2] sm:$0x3]  ;;  %vm525_vm2 = vcmask 31744  }
  0x77   : > { %v5087_v3 = vld [vmem:[%s5072_s27] sm:$0xff]   ;;  %4573 = vmatprep.subr.msk.bf16.mxu0 %vm580_vm0, %v5084_v1  ;;  %4569 = vmatprep.subr.msk.bf16.mxu1 %vm580_vm0, %v282_v2  ;;  %v5094_v4 = vsel %vm580_vm0, %v5084_v1, 0  ;;  %v582_v5 = vsel %vm580_vm0, %v282_v2, 0  ;;  %v5099_v6 = vld [vmem:[%s5072_s27 + $0x8] sm:$0xff]   ;;  %vm376_vm1 = vsmask.f32 7424 }
  0x78   : > { %6136 = vst [vmem:[#allocation15_spill] sm:$0xff] %v5094_v4  ;;  %4090 = vmatpush3.bf16.msra.mxu0 %v5094_v4  ;;  %3938 = vmatpush3.bf16.msra.mxu1 %v582_v5  ;;  %v378_v7 = vshrl.u32 %v5087_v3, 16  ;;  %v380_v8 = vshll.u32 %v5087_v3, 16  ;;  %v385_v9 = vshll.u32 %v5099_v6, 16  ;;  %v389_v10 = vshrl.u32 %v5099_v6, 16  ;;  %v5106_v11 = vld [vmem:[%s5072_s27 + $0x10] sm:$0xff]  }
  0x79   : > { %v5109_v12 = vld [vmem:[%s5072_s27 + $0x18] sm:$0xff]   ;;  %vm1523_vm3 = vsmask.f32 6400  ;;  %v1880_v14 = vld [vmem:[#allocation5 + $0xa] sm:$0x3]  ;;  %v5112_v16 = vshll.u32 %v5106_v11, 16 }
  0x7a   : > { %v382_v13 = vrot.slane %v380_v8, 1  ;;  %v387_v15 = vrot.slane %v385_v9, 1  ;;  %v5115_v17 = vshrl.u32 %v5106_v11, 16  ;;  %v1524_v18 = vrot.slane %v389_v10, 1  ;;  %4575 = vmatprep.subr.msk.bf16.mxu0 %vm580_vm0, %v1880_v14  ;;  %v5125_v23 = vld [vmem:[%s5072_s27 + $0x20] sm:$0xff]   ;;  %v5131_v29 = vld [vmem:[%s5072_s27 + $0x28] sm:$0xff]  }
  0x7b   : > { %v1525_v20 = vrot.slane %v385_v9, 2  ;;  %v5119_v21 = vshll.u32 %v5109_v12, 16  ;;  %v5122_v22 = vshrl.u32 %v5109_v12, 16  ;;  %v1528_v26 = vrot.slane %v5112_v16, 2  ;;  %v280_v28 = vld [vmem:[#allocation5] sm:$0x3] }
  0x7c   : > { %v383_v19 = vor.u32 %v382_v13, %v378_v7  ;;  %v391_v24 = vor.u32 %v389_v10, %v387_v15  ;;  %v1527_v25 = vrot.slane %v5115_v17, 1  ;;  %v395_v27 = vrot.slane %v5112_v16, 1  ;;  %4570 = vmatprep.subr.msk.bf16.mxu1 %vm580_vm0, %v280_v28  ;;  %v5150_v42 = vld [vmem:[%s5072_s27 + $0x30] sm:$0xff]   ;;  %v5161_v47 = vld [vmem:[%s5072_s27 + $0x38] sm:$0xff]   ;;  %v5182_v60 = vld [vmem:[%s5072_s27 + $0x40] sm:$0xff]   ;;  %s4895_s20 = smov [#allocation8]  }
  0x7d   : > { %v1526_v31 = vor.u32 %v1525_v20, %v1524_v18  ;;  %v1531_v32 = vrot.slane %v5122_v22, 1  ;;  %v1532_v33 = vrot.slane %v5119_v21, 2  ;;  %v1974_v36 = vsel %vm580_vm0, %v1880_v14, 0  ;;  %v5199_v13 = vld [vmem:[%s5072_s27 + $0x48] sm:$0xff]   ;;  %v5208_v20 = vld [vmem:[%s5072_s27 + $0x50] sm:$0xff]   ;;  %s3474_s21 = sshll.u32 %s4895_s20, 4  ;;  %s3475_s21 = int_to_ptr.vmem [resolvable:$true] %s3474_s21 }
  0x7e   : > { %v388_v30 = vsel %vm376_vm1, %v383_v19, %v387_v15  ;;  %v1529_v34 = vor.u32 %v1528_v26, %v1527_v25  ;;  %v396_v35 = vsel %vm376_vm1, %v391_v24, %v395_v27  ;;  %v399_v37 = vor.u32 %v5115_v17, %v395_v27  ;;  %v5210_v24 = vld [vmem:[#allocation5 + $0xc] sm:$0x3]  ;;  %p4616_p10 = scmp.eq.s32.totalorder %s4941_s19, 1  ;;  %s4896_s15 = smov [#allocation9]  }
  0x7f   : > { %3939 = vmatprep.mubr.msk.bf16.mxu1 %vm525_vm2, %v388_v30  ;;  %v1533_v38 = vor.u32 %v1532_v33, %v1531_v32  ;;  %v403_v39 = vrot.slane %v5119_v21, 1  ;;  %v5144_v40 = vshll.u32 %v5125_v23, 16  ;;  %v5147_v41 = vshrl.u32 %v5125_v23, 16  ;;  %s3485_s26 = sshll.u32 %s4896_s15, 4  ;;  %s4784_s25 = scalar_lea.vmem %s3475_s21, 16  ;;  %s6025_s26 = int_to_ptr.vmem [resolvable:$true] %s3485_s26 }
  0x80   : > { %3940 = vmatmul.mubr.msk.bf16.vlgmr.msra.gmra.mrb[0].mxu1 %vm525_vm2, %v396_v35  ;;  %v1530_v43 = vsel %vm1523_vm3, %v1526_v31, %v1529_v34  ;;  %v798_v44 = vsel %vm580_vm0, %v280_v28, 0  ;;  %v5155_v45 = vshll.u32 %v5131_v29, 16  ;;  %v5158_v46 = vshrl.u32 %v5131_v29, 16  ;;  %p4785_p9 = scmp.ne.s32.totalorder %s3475_s21, %s4784_s25  ;;  %s4790_s18 = scalar_lea.vmem %s3475_s21, 32 }
  0x81   : > { %4091 = vmatprep.mubr.msk.bf16.mxu0 %vm525_vm2, %v1530_v43  ;;  %v1534_v48 = vsel %vm1523_vm3, %v1529_v34, %v1533_v38  ;;  %v404_v49 = vsel %vm376_vm1, %v399_v37, %v403_v39  ;;  %v1535_v50 = vrot.slane %v5147_v41, 1  ;;  %v1536_v51 = vrot.slane %v5144_v40, 2  ;;  %3976 = vmatpush3.bf16.msra.mxu1 %v798_v44  ;;  %p4791_p5 = scmp.lt.s32.totalorder %s3475_s21, %s3475_s21  ;;  %p4792_p6 = scmp.lt.s32.totalorder %s4790_s18, %s4784_s25 }
  0x82   : > { %4092 = vmatmul.mubr.msk.bf16.vlgmr.msra.gmra.mrb[0].mxu0 %vm525_vm2, %v1534_v48  ;;  %3943 = vmatprep.mubr.msk.bf16.mxu1 %vm525_vm2, %v404_v49  ;;  %v407_v52 = vor.u32 %v5122_v22, %v403_v39  ;;  %v411_v53 = vrot.slane %v5144_v40, 1  ;;  %v1539_v54 = vrot.slane %v5158_v46, 1  ;;  %v1540_v55 = vrot.slane %v5155_v45, 2  ;;  %p4786_p1 = pnand %p4785_p9, %p4616_p10 }
  0x83   : > { %4128 = vmatpush3.bf16.msra.mxu0 %v1974_v36  ;;  %v1537_v56 = vor.u32 %v1536_v51, %v1535_v50  ;;  %v419_v57 = vrot.slane %v5155_v45, 1  ;;  %v5176_v58 = vshll.u32 %v5150_v42, 16  ;;  %v5179_v59 = vshrl.u32 %v5150_v42, 16  ;;  %p4793_p12 = por %p4792_p6, %p4791_p5 }
  0x84   : > { %v412_v61 = vsel %vm376_vm1, %v407_v52, %v411_v53  ;;  %v1541_v62 = vor.u32 %v1540_v55, %v1539_v54  ;;  %v415_v63 = vor.u32 %v5147_v41, %v411_v53  ;;  %v5187_v0 = vshll.u32 %v5161_v47, 16  ;;  %4576 = vmatprep.subr.msk.bf16.mxu0 %vm580_vm0, %v5210_v24  ;;  %v5247_v52 = vld [vmem:[%s5072_s27 + $0x58] sm:$0xff]   ;;  %p4787_p4 = pneg %p4786_p1 }
  0x85   : > { %v1538_v2 = vsel %vm1523_vm3, %v1533_v38, %v1537_v56  ;;  %v1543_v5 = vrot.slane %v5179_v59, 1  ;;  %v1544_v7 = vrot.slane %v5176_v58, 2  ;;  %v5196_v10 = vshrl.u32 %v5161_v47, 16 }
  0x86   : > { %4095 = vmatprep.mubr.msk.bf16.mxu0 %vm525_vm2, %v1538_v2  ;;  %v1542_v8 = vsel %vm1523_vm3, %v1537_v56, %v1541_v62  ;;  %v420_v9 = vsel %vm376_vm1, %v415_v63, %v419_v57  ;;  %v427_v15 = vrot.slane %v5176_v58, 1  ;;  %v1548_v18 = vrot.slane %v5187_v0, 2  ;;  %p4794_p0 = pnand %p4793_p12, %p4787_p4 }
  0x87   : > { %v1545_v14 = vor.u32 %v1544_v7, %v1543_v5  ;;  %v5205_v19 = vshll.u32 %v5182_v60, 16  ;;  %v423_v25 = vor.u32 %v5158_v46, %v419_v57  ;;  %v1547_v26 = vrot.slane %v5196_v10, 1 }
  0x88   : > { %3944 = vmatmul.mubr.msk.bf16.gmra.mrb[4].mxu1 %vm525_vm2, %v412_v61  ;;  %v5216_v27 = vshrl.u32 %v5182_v60, 16  ;;  %v431_v30 = vor.u32 %v5179_v59, %v427_v15  ;;  %v435_v31 = vrot.slane %v5187_v0, 1  ;;  %v5228_v35 = vshll.u32 %v5199_v13, 16 }
  0x89   : > { %3947 = vmatprep.mubr.msk.bf16.mxu1 %vm525_vm2, %v420_v9  ;;  %v1546_v28 = vsel %vm1523_vm3, %v1541_v62, %v1545_v14  ;;  %v1552_v32 = vrot.slane %v5205_v19, 2  ;;  %v1549_v34 = vor.u32 %v1548_v18, %v1547_v26  ;;  %v5231_v36 = vshrl.u32 %v5199_v13, 16  ;;  %v5256_v62 = vld [vmem:[#allocation5 + $0x4] sm:$0x3]  ;;  %v5276_v26 = vld [vmem:[%s5072_s27 + $0x60] sm:$0xff]  }
  0x8a   : > { %4096 = vmatmul.mubr.msk.bf16.gmra.mrb[4].mxu0 %vm525_vm2, %v1542_v8  ;;  %v1551_v33 = vrot.slane %v5216_v27, 1  ;;  %v428_v37 = vsel %vm376_vm1, %v423_v25, %v427_v15  ;;  %v5235_v39 = vshll.u32 %v5208_v20, 16  ;;  %v436_v43 = vsel %vm376_vm1, %v431_v30, %v435_v31  ;;  %4571 = vmatprep.subr.msk.bf16.mxu1 %vm580_vm0, %v5256_v62 }
  0x8b   : > { %4099 = vmatprep.mubr.msk.bf16.mxu0 %vm525_vm2, %v1546_v28  ;;  %v5239_v44 = vshrl.u32 %v5208_v20, 16  ;;  %v1550_v48 = vsel %vm1523_vm3, %v1545_v14, %v1549_v34  ;;  %v443_v49 = vrot.slane %v5205_v19, 1  ;;  %v1555_v50 = vrot.slane %v5231_v36, 1 }
  0x8c   : > { %v1553_v38 = vor.u32 %v1552_v32, %v1551_v33  ;;  %v1556_v51 = vrot.slane %v5228_v35, 2  ;;  %v439_v54 = vor.u32 %v5196_v10, %v435_v31  ;;  %v1560_v56 = vrot.slane %v5235_v39, 2  ;;  %v5284_v33 = vld [vmem:[%s5072_s27 + $0x68] sm:$0xff]  }
  0x8d   : > { %v1559_v55 = vrot.slane %v5239_v44, 1  ;;  %v447_v57 = vor.u32 %v5216_v27, %v443_v49  ;;  %v451_v61 = vrot.slane %v5228_v35, 1  ;;  %v5263_v2 = vshll.u32 %v5247_v52, 16 }
  0x8e   : > { %v1554_v53 = vsel %vm1523_vm3, %v1549_v34, %v1553_v38  ;;  %v1557_v63 = vor.u32 %v1556_v51, %v1555_v50  ;;  %v5266_v5 = vshrl.u32 %v5247_v52, 16  ;;  %v444_v7 = vsel %vm376_vm1, %v439_v54, %v443_v49 }
  0x8f   : > { %6137 = vst [vmem:[#allocation16_spill] sm:$0xff] %v5263_v2  ;;  %v1561_v8 = vor.u32 %v1560_v56, %v1559_v55  ;;  %v452_v9 = vsel %vm376_vm1, %v447_v57, %v451_v61  ;;  %v459_v15 = vrot.slane %v5235_v39, 1  ;;  %v1564_v25 = vrot.slane %v5263_v2, 2  ;;  %v5308_v55 = vld [vmem:[%s5072_s27 + $0x70] sm:$0xff]  }
  0x90   : > { %3948 = vmatmul.mubr.msk.bf16.gmra.mrb[8].mxu1 %vm525_vm2, %v428_v37  ;;  %6138 = vst [vmem:[#allocation17_spill] sm:$0xff] %v5266_v5  ;;  %v1558_v14 = vsel %vm1523_vm3, %v1553_v38, %v1557_v63  ;;  %v1563_v18 = vrot.slane %v5266_v5, 1  ;;  %v455_v30 = vor.u32 %v5231_v36, %v451_v61  ;;  %v467_v32 = vrot.slane %v5263_v2, 1 }
  0x91   : > { %3951 = vmatprep.mubr.msk.bf16.mxu1 %vm525_vm2, %v436_v43  ;;  %v1562_v28 = vsel %vm1523_vm3, %v1557_v63, %v1561_v8  ;;  %v463_v31 = vor.u32 %v5239_v44, %v459_v15  ;;  %v5291_v37 = vshll.u32 %v5276_v26, 16  ;;  %v1882_v43 = vrot.slane %v5099_v6, 2 }
  0x92   : > { %4100 = vmatmul.mubr.msk.bf16.gmra.mrb[8].mxu0 %vm525_vm2, %v1550_v48  ;;  %v5288_v34 = vor.u32 %v1564_v25, %v1563_v18  ;;  %v460_v38 = vsel %vm376_vm1, %v455_v30, %v459_v15  ;;  %v1883_v48 = vrot.slane %v5106_v11, 2  ;;  %vm1881_vm4 = vcmask 1045504  }
  0x93   : > { %4103 = vmatprep.mubr.msk.bf16.mxu0 %vm525_vm2, %v1554_v53  ;;  %6140 = vst [vmem:[#allocation19_spill] sm:$0xff] %v5291_v37  ;;  %v468_v49 = vsel %vm376_vm1, %v463_v31, %v467_v32  ;;  %v5298_v50 = vshrl.u32 %v5276_v26, 16  ;;  %v5301_v51 = vshll.u32 %v5284_v33, 16  ;;  %v475_v54 = vrot.slane %v5291_v37, 1  ;;  %v276_v31 = vld [vmem:[%s5072_s27 + $0x94] sm:$0xf] }
  0x94   : > { %6139 = vst [vmem:[#allocation18_spill] sm:$0xff] %v5288_v34  ;;  %v1566_v53 = vsel %vm1523_vm3, %v1561_v8, %v5288_v34  ;;  %v1884_v56 = vsel %vm1881_vm4, %v1882_v43, %v1883_v48  ;;  %v471_v57 = vor.u32 %v5266_v5, %v467_v32  ;;  %v1885_v8 = vrot.slane %v5109_v12, 2  ;;  %v5343_v43 = vld [vmem:[%s5072_s27 + $0x80] sm:$0xff]  }
  0x95   : > { %6141 = vst [vmem:[#allocation20_spill] sm:$0xff] %v5298_v50  ;;  %6142 = vst [vmem:[#allocation21_spill] sm:$0xff] %v5301_v51  ;;  %v479_v61 = vor.u32 %v5298_v50, %v475_v54  ;;  %v483_v63 = vrot.slane %v5301_v51, 1  ;;  %v1887_v15 = vrot.slane %v5125_v23, 2  ;;  %v5327_v18 = vshrl.u32 %v5284_v33, 16 }
  0x96   : > { %v5339_v32 = vsel %vm1881_vm4, %v1883_v48, %v1885_v8  ;;  %v5360_v34 = vld [vmem:[#allocation5 + $0xe] sm:$0x3]  ;;  %vm2425_vm5 = vsmask.f32 5376  ;;  %v2433_v5 = vrot.slane %v5147_v41, 2  ;;  %vm979_vm6 = vcmask 1046528  }
  0x97   : > { %6144 = vst [vmem:[#allocation23_spill] sm:$0xff] %v5327_v18  ;;  %v484_v25 = vsel %vm376_vm1, %v479_v61, %v483_v63  ;;  %v5356_v61 = vld [vmem:[%s5072_s27 + $0x88] sm:$0xff]   ;;  %vm2783_vm7 = vcmask 1044480  }
  0x98   : > { %3952 = vmatmul.mubr.msk.bf16.gmra.mrb[12].mxu1 %vm525_vm2, %v444_v7  ;;  %v5316_v7 = vld [vmem:[%s5072_s27 + $0x78] sm:$0xff]   ;;  %v5389_v51 = vshll.u32 %v5356_v61, 16 }
  0x99   : > { %3955 = vmatprep.mubr.msk.bf16.mxu1 %vm525_vm2, %v452_v9  ;;  %v5322_v9 = vshll.u32 %v5308_v55, 16  ;;  %v5334_v30 = vshll.u32 %v5316_v7, 16 }
  0x9a   : > { %4104 = vmatmul.mubr.msk.bf16.gmra.mrb[12].mxu0 %vm525_vm2, %v1558_v14  ;;  %v476_v14 = vsel %vm376_vm1, %v471_v57, %v475_v54  ;;  %v487_v54 = vor.u32 %v5327_v18, %v483_v63  ;;  %v1889_v63 = vrot.slane %v5131_v29, 2  ;;  %6151 = vst [vmem:[#allocation30_spill] sm:$0xff] %v5389_v51 }
  0x9b   : > { %4107 = vmatprep.mubr.msk.bf16.mxu0 %vm525_vm2, %v1562_v28  ;;  %6143 = vst [vmem:[#allocation22_spill] sm:$0xff] %v5322_v9  ;;  %v5331_v28 = vshrl.u32 %v5308_v55, 16  ;;  %6146 = vst [vmem:[#allocation25_spill] sm:$0xff] %v5334_v30  ;;  %v499_v48 = vrot.slane %v5334_v30, 1 }
  0x9d   : > { %6145 = vst [vmem:[#allocation24_spill] sm:$0xff] %v5331_v28 }
  0xa0   : > { %3956 = vmatmul.mubr.msk.bf16.gmra.mrb[16].mxu1 %vm525_vm2, %v460_v38  ;;  %v491_v38 = vrot.slane %v5322_v9, 1  ;;  %v1891_v9 = vrot.slane %v5150_v42, 2 }
  0xa1   : > { %3959 = vmatprep.mubr.msk.bf16.mxu1 %vm525_vm2, %v468_v49  ;;  %v2208_v49 = vsel %vm580_vm0, %v5210_v24, 0  ;;  %v5365_v24 = vld [vmem:[%s5072_s27 + $0x98] sm:$0xf] }
  0xa2   : > { %4108 = vmatmul.mubr.msk.bf16.gmra.mrb[16].mxu0 %vm525_vm2, %v1566_v53  ;;  %v5349_v53 = vsel %vm1881_vm4, %v1885_v8, %v1887_v15  ;;  %v495_v57 = vor.u32 %v5331_v28, %v491_v38  ;;  %v278_v8 = vld [vmem:[%s5072_s27 + $0x9c] sm:$0xf]  ;;  %v492_v4 = vsel %vm376_vm1, %v487_v54, %v491_v38  ;;  %v5397_v38 = vsel %vm1881_vm4, %v1887_v15, %v1889_v63 }
  0xa3   : > { %4129 = vmatprep.mubr.msk.bf16.mxu0 %vm525_vm2, %v1884_v56  ;;  %v275_v56 = vld [vmem:[%s5072_s27 + $0x90] sm:$0xf]  ;;  %v5378_v30 = vcombine.low %v5365_v24, %v278_v8  ;;  %v515_v15 = vrot.slane %v5389_v51, 1  ;;  %v2430_v51 = vrot.slane %v5119_v21, 3 }
  0xa4   : > { %v500_v28 = vsel %vm376_vm1, %v495_v57, %v499_v48  ;;  %v5411_v50 = vcombine.low %v275_v56, %v275_v56 }
  0xa5   : > { %v6118_v8 = vrot.slane %v5378_v30, 2 }
  0xa8   : > { %3960 = vmatmul.mubr.msk.bf16.gmra.mrb[20].mxu1 %vm525_vm2, %v476_v14  ;;  %v5358_v14 = vcombine.low %v275_v56, %v276_v31  ;;  %v5375_v31 = vshll.u32 %v5343_v43, 16  ;;  %v1895_v56 = vrot.slane %v5182_v60, 2 }
  0xa9   : > { %3963 = vmatprep.mubr.msk.bf16.mxu1 %vm525_vm2, %v484_v25  ;;  %v5372_v25 = vshrl.u32 %v5316_v7, 16 }
  0xaa   : > { %6147 = vst [vmem:[#allocation26_spill] sm:$0xff] %v5358_v14  ;;  %4130 = vmatmul.mubr.msk.bf16.vlgmr.msra.gmra.mrb[0].mxu0 %vm525_vm2, %v5339_v32  ;;  %6149 = vst [vmem:[#allocation28_spill] sm:$0xff] %v5375_v31  ;;  %v5392_v18 = vrot.slane %v5358_v14, 2  ;;  %v507_v37 = vrot.slane %v5375_v31, 1  ;;  %v5409_v14 = vsel %vm1881_vm4, %v1889_v63, %v1891_v9  ;;  %v2426_v31 = vrot.slane %v5115_v17, 2 }
  0xab   : > { %4166 = vmatpush3.bf16.msra.mxu0 %v2208_v49  ;;  %4133 = vmatprep.mubr.msk.bf16.mxu0 %vm525_vm2, %v5349_v53  ;;  %6148 = vst [vmem:[#allocation27_spill] sm:$0xff] %v5372_v25  ;;  %v5383_v49 = vshrl.u32 %v5343_v43, 16  ;;  %v503_v54 = vor.u32 %v5372_v25, %v499_v48  ;;  %v1893_v48 = vrot.slane %v5161_v47, 2  ;;  %v2429_v63 = vrot.slane %v5122_v22, 2 }
  0xac   : > { %4577 = vmatprep.subr.msk.bf16.mxu0 %vm580_vm0, %v5360_v34  ;;  %v5405_v57 = vsel %vm1881_vm4, %v5392_v18, %v6118_v8  ;;  %v2427_v8 = vrot.slane %v5112_v16, 3  ;;  %v521_v25 = vshll.u32 %v5411_v50, 16 }
  0xad   : > { %6150 = vst [vmem:[#allocation29_spill] sm:$0xff] %v5383_v49  ;;  %v2431_v2 = vor.u32 %v2430_v51, %v2429_v63  ;;  %v5435_v22 = vsel %vm1881_vm4, %v1891_v9, %v1893_v48  ;;  %v2438_v9 = vrot.slane %v5155_v45, 3 }
  0xae   : > { %v2428_v17 = vor.u32 %v2427_v8, %v2426_v31  ;;  %v5442_v31 = vsel %vm1881_vm4, %v1893_v48, %v1895_v56  ;;  %v523_v8 = vrot.slane %v521_v25, 1  ;;  %v2442_v48 = vrot.slane %v5176_v58, 3 }
  0xb0   : > { %3964 = vmatmul.mubr.msk.bf16.gmra.mrb[24].mxu1 %vm525_vm2, %v492_v4  ;;  %v511_v4 = vor.u32 %v5383_v49, %v507_v37  ;;  %v5427_v49 = vshrl.u32 %v5356_v61, 16  ;;  %v5438_v21 = vsel %vm2425_vm5, %v2428_v17, %v2431_v2  ;;  %v1901_v17 = vrot.slane %v5247_v52, 2 }
  0xb1   : > { %3967 = vmatprep.mubr.msk.bf16.mxu1 %vm525_vm2, %v500_v28  ;;  %v508_v28 = vsel %vm376_vm1, %v503_v54, %v507_v37  ;;  %v2434_v37 = vrot.slane %v5144_v40, 3  ;;  %v1897_v40 = vrot.slane %v5199_v13, 2 }
  0xb2   : > { %4134 = vmatmul.mubr.msk.bf16.gmra.mrb[4].mxu0 %vm525_vm2, %v5397_v38  ;;  %v516_v16 = vsel %vm376_vm1, %v511_v4, %v515_v15  ;;  %v519_v51 = vor.u32 %v5427_v49, %v515_v15  ;;  %v1899_v15 = vrot.slane %v5208_v20, 2 }
  0xb3   : > { %4137 = vmatprep.mubr.msk.bf16.mxu0 %vm525_vm2, %v5409_v14  ;;  %v2435_v54 = vor.u32 %v2434_v37, %v2433_v5  ;;  %v2437_v5 = vrot.slane %v5158_v46, 2 }
  0xb4   : > { %v524_v4 = vsel %vm376_vm1, %v519_v51, %v523_v8  ;;  %v5469_v45 = vsel %vm1881_vm4, %v1897_v40, %v1899_v15  ;;  %v2449_v51 = vrot.slane %v5216_v27, 2  ;;  %v2450_v8 = vrot.slane %v5205_v19, 3 }
  0xb5   : > { %v5446_v41 = vsel %vm2425_vm5, %v2431_v2, %v2435_v54  ;;  %v2439_v25 = vor.u32 %v2438_v9, %v2437_v5  ;;  %v2441_v2 = vrot.slane %v5179_v59, 2  ;;  %v2445_v59 = vrot.slane %v5196_v10, 2 }
  0xb6   : > { %v2451_v5 = vor.u32 %v2450_v8, %v2449_v51  ;;  %v2453_v27 = vrot.slane %v5231_v36, 2  ;;  %v2454_v9 = vrot.slane %v5228_v35, 3  ;;  %v5563_v51 = vcombine.low %v5365_v24, %v5365_v24 }
  0xb7   : > { %v5464_v63 = vsel %vm2425_vm5, %v2435_v54, %v2439_v25  ;;  %v2443_v46 = vor.u32 %v2442_v48, %v2441_v2  ;;  %v1072_v54 = vsel %vm580_vm0, %v5256_v62, 0  ;;  %v2457_v2 = vrot.slane %v5239_v44, 2 }
  0xb8   : > { %3968 = vmatmul.mubr.msk.bf16.gmra.mrb[28].mxu1 %vm525_vm2, %v508_v28  ;;  %v5461_v28 = vsel %vm1881_vm4, %v1895_v56, %v1897_v40  ;;  %v2446_v56 = vrot.slane %v5187_v0, 3  ;;  %v5486_v40 = vld [vmem:[#allocation5 + $0x6] sm:$0x3]  ;;  %v5494_v0 = vsel %vm1881_vm4, %v1899_v15, %v1901_v17  ;;  %v1907_v15 = vrot.slane %v5308_v55, 2 }
  0xb9   : > { %3971 = vmatprep.mubr.msk.bf16.mxu1 %vm525_vm2, %v516_v16  ;;  %v5474_v58 = vsel %vm2425_vm5, %v2439_v25, %v2443_v46  ;;  %v1903_v16 = vrot.slane %v5276_v26, 2  ;;  %v2455_v25 = vor.u32 %v2454_v9, %v2453_v27  ;;  %v2458_v48 = vrot.slane %v5235_v39, 3  ;;  %v5591_v9 = vld [vmem:[#allocation5 + $0x10] sm:$0x3] }
  0xba   : > { %4138 = vmatmul.mubr.msk.bf16.gmra.mrb[8].mxu0 %vm525_vm2, %v5435_v22  ;;  %v2447_v37 = vor.u32 %v2446_v56, %v2445_v59  ;;  %v1909_v44 = vrot.slane %v5316_v7, 2  ;;  %v1911_v56 = vrot.slane %v5343_v43, 2  ;;  %v2566_v27 = vsel %vm580_vm0, %v5360_v34, 0 }
  0xbb   : > { %4141 = vmatprep.mubr.msk.bf16.mxu0 %vm525_vm2, %v5442_v31  ;;  %v5499_v62 = vsel %vm1881_vm4, %v1901_v17, %v1903_v16  ;;  %v5524_v36 = vor.u32 %v2458_v48, %v2457_v2  ;;  %v980_v34 = vrot.slane %v5087_v3, 1  ;;  %v997_v2 = vrot.slane %v5199_v13, 1  ;;  %v3098_v48 = vld [vmem:[#allocation7 + $0x38] sm:$0xff] }
  0xbc   : > { %v5489_v10 = vsel %vm2425_vm5, %v2443_v46, %v2447_v37  ;;  %v5504_v19 = vsel %vm2425_vm5, %v2447_v37, %v2451_v5  ;;  %v5517_v46 = vsel %vm2425_vm5, %v2451_v5, %v2455_v25  ;;  %v5544_v17 = vsel %vm1881_vm4, %v1907_v15, %v1909_v44 }
  0xbd   : > { %v5533_v39 = vsel %vm2425_vm5, %v2455_v25, %v5524_v36  ;;  %v1913_v37 = vrot.slane %v5356_v61, 2  ;;  %v1917_v5 = vrot.slane %v5563_v51, 2 }
  0xbf   : > { %v5569_v8 = vsel %vm1881_vm4, %v1913_v37, %v5392_v18  ;;  %v1918_v24 = vsel %vm1881_vm4, %v5392_v18, %v1917_v5  ;;  %v981_v18 = vrot.slane %v5099_v6, 1 }
  0xc0   : > { %3972 = vmatmul.mubr.msk.bf16.gmra.mrb[32].mxu1 %vm525_vm2, %v524_v4  ;;  %v1905_v4 = vrot.slane %v5284_v33, 2 }
  0xc1   : > { %3977 = vmatprep.mubr.msk.bf16.mxu1 %vm525_vm2, %v5087_v3  ;;  %v985_v3 = vrot.slane %v5109_v12, 1 }
  0xc2   : > { %4142 = vmatmul.mubr.msk.bf16.gmra.mrb[12].mxu0 %vm525_vm2, %v5461_v28  ;;  %v5522_v35 = vsel %vm1881_vm4, %v1903_v16, %v1905_v4  ;;  %v5529_v59 = vsel %vm1881_vm4, %v1905_v4, %v1907_v15  ;;  %v5549_v16 = vsel %vm1881_vm4, %v1909_v44, %v1911_v56  ;;  %v3096_v15 = vld [vmem:[#allocation7 + $0x28] sm:$0xff] }
  0xc3   : > { %4145 = vmatprep.mubr.msk.bf16.mxu0 %vm525_vm2, %v5469_v45  ;;  %v3100_v44 = vld [vmem:[#allocation7 + $0x48] sm:$0xff] }
  0xc8   : > { %3978 = vmatmul.mubr.msk.bf16.vlgmr.msra.gmra.mrb[0].mxu1 %vm525_vm2, %v5099_v6 }
  0xc9   : > { %3981 = vmatprep.mubr.msk.bf16.mxu1 %vm525_vm2, %v5106_v11  ;;  %4014 = vmatpush3.bf16.msra.mxu1 %v1072_v54  ;;  %v5559_v54 = vsel %vm1881_vm4, %v1911_v56, %v1913_v37  ;;  %v3102_v37 = vld [vmem:[#allocation7 + $0x58] sm:$0xff] }
  0xca   : > { %4572 = vmatprep.subr.msk.bf16.mxu1 %vm580_vm0, %v5486_v40  ;;  %4146 = vmatmul.mubr.msk.bf16.gmra.mrb[16].mxu0 %vm525_vm2, %v5494_v0 }
  0xcb   : > { %4149 = vmatprep.mubr.msk.bf16.mxu0 %vm525_vm2, %v5499_v62 }
  0xd0   : > { %3982 = vmatmul.mubr.msk.bf16.gmra.mrb[4].mxu1 %vm525_vm2, %v5109_v12  ;;  %v987_v12 = vrot.slane %v5125_v23, 1 }
  0xd1   : > { %3985 = vmatprep.mubr.msk.bf16.mxu1 %vm525_vm2, %v5125_v23  ;;  %v3092_v23 = vld [vmem:[#allocation7 + $0x8] sm:$0xff] }
  0xd2   : > { %4150 = vmatmul.mubr.msk.bf16.gmra.mrb[20].mxu0 %vm525_vm2, %v5522_v35 }
  0xd3   : > { %4153 = vmatprep.mubr.msk.bf16.mxu0 %vm525_vm2, %v5529_v59 }
  0xd8   : > { %3986 = vmatmul.mubr.msk.bf16.gmra.mrb[8].mxu1 %vm525_vm2, %v5131_v29 }
  0xd9   : > { %3989 = vmatprep.mubr.msk.bf16.mxu1 %vm525_vm2, %v5150_v42 }
  0xda   : > { %4154 = vmatmul.mubr.msk.bf16.gmra.mrb[24].mxu0 %vm525_vm2, %v5544_v17 }
  0xdb   : > { %4157 = vmatprep.mubr.msk.bf16.mxu0 %vm525_vm2, %v5549_v16 }
  0xe0   : > { %3990 = vmatmul.mubr.msk.bf16.gmra.mrb[12].mxu1 %vm525_vm2, %v5161_v47 }
  0xe1   : > { %3993 = vmatprep.mubr.msk.bf16.mxu1 %vm525_vm2, %v5182_v60 }
  0xe2   : > { %4158 = vmatmul.mubr.msk.bf16.gmra.mrb[28].mxu0 %vm525_vm2, %v5559_v54 }
  0xe3   : > { %4161 = vmatprep.mubr.msk.bf16.mxu0 %vm525_vm2, %v5569_v8 }
  0xe8   : > { %3994 = vmatmul.mubr.msk.bf16.gmra.mrb[16].mxu1 %vm525_vm2, %v5199_v13  ;;  %v5688_v13 = vld [vmem:[%s5072_s27 + $0xa0] ss:$0 sps:$4 sm:$0xff]  }
  0xe9   : > { %3997 = vmatprep.mubr.msk.bf16.mxu1 %vm525_vm2, %v5208_v20  ;;  %v2199_v5 = vrot.slane %v5688_v13, 2 }
  0xea   : > { %4162 = vmatmul.mubr.msk.bf16.gmra.mrb[32].mxu0 %vm525_vm2, %v1918_v24 }
  0xeb   : > { %4167 = vmatprep.mubr.msk.bf16.mxu0 %vm525_vm2, %v5339_v32  ;;  %v982_v32 = vsel %vm979_vm6, %v980_v34, %v981_v18  ;;  %v3105_v34 = vld [vmem:[#allocation7 + $0x70] sm:$0xff] }
  0xf0   : > { %3998 = vmatmul.mubr.msk.bf16.gmra.mrb[20].mxu1 %vm525_vm2, %v5247_v52 }
  0xf1   : > { %4001 = vmatprep.mubr.msk.bf16.mxu1 %vm525_vm2, %v5276_v26 }
  0xf2   : > { %4168 = vmatmul.mubr.msk.bf16.vlgmr.msra.gmra.mrb[0].mxu0 %vm525_vm2, %v5349_v53  ;;  %v983_v53 = vrot.slane %v5106_v11, 1  ;;  %v1306_v11 = vsel %vm580_vm0, %v5486_v40, 0 }
  0xf3   : > { %4204 = vmatpush3.bf16.msra.mxu0 %v2566_v27  ;;  %4171 = vmatprep.mubr.msk.bf16.mxu0 %vm525_vm2, %v5397_v38  ;;  %v3104_v27 = vld [vmem:[#allocation7 + $0x68] sm:$0xff] }
  0xf4   : > { %4578 = vmatprep.subr.msk.bf16.mxu0 %vm580_vm0, %v5591_v9  ;;  %v5628_v6 = vsel %vm979_vm6, %v981_v18, %v983_v53  ;;  %v5631_v38 = vsel %vm979_vm6, %v983_v53, %v985_v3  ;;  %v3106_v53 = vld [vmem:[#allocation7 + $0x78] sm:$0xff] }
  0xf8   : > { %4002 = vmatmul.mubr.msk.bf16.gmra.mrb[24].mxu1 %vm525_vm2, %v5284_v33 }
  0xf9   : > { %4005 = vmatprep.mubr.msk.bf16.mxu1 %vm525_vm2, %v5308_v55 }
  0xfa   : > { %4172 = vmatmul.mubr.msk.bf16.gmra.mrb[4].mxu0 %vm525_vm2, %v5409_v14  ;;  %v4894_v14 = vmov 0  }
  0xfb   : > { %4175 = vmatprep.mubr.msk.bf16.mxu0 %vm525_vm2, %v5435_v22  ;;  %4664 = vset.pattern.permute.xlu0 %v4894_v14  ;;  %v989_v22 = vrot.slane %v5131_v29, 1  ;;  %v993_v29 = vrot.slane %v5161_v47, 1  ;;  %v995_v47 = vrot.slane %v5182_v60, 1  ;;  %v3101_v60 = vld [vmem:[#allocation7 + $0x50] sm:$0xff] }
  0xfc   : > { %4665 = vset.pattern.permute.xlu1 %v4894_v14 }
  0xfd   : > { %v5651_v40 = vsel %vm979_vm6, %v987_v12, %v989_v22  ;;  %v5683_v56 = vsel %vm979_vm6, %v995_v47, %v997_v2 }
 0x100   : > { %4006 = vmatmul.mubr.msk.bf16.gmra.mrb[28].mxu1 %vm525_vm2, %v5316_v7 }
 0x101   : > { %4009 = vmatprep.mubr.msk.bf16.mxu1 %vm525_vm2, %v5343_v43 }
 0x102   : > { %4176 = vmatmul.mubr.msk.bf16.gmra.mrb[8].mxu0 %vm525_vm2, %v5442_v31  ;;  %v3091_v31 = vld [vmem:[#allocation7] sm:$0xff] }
 0x103   : > { %4179 = vmatprep.mubr.msk.bf16.mxu0 %vm525_vm2, %v5461_v28  ;;  %v3093_v28 = vld [vmem:[#allocation7 + $0x10] sm:$0xff]  ;;  %3129 = vperm.xlu0 %4664, %v3091_v31   ;;  %v2876_v31 = vsel %vm580_vm0, %v5591_v9, 0 }
 0x104   : > { %3139 = vperm.xlu1 %4665, %v3093_v28   ;;  %v1009_v28 = vrot.slane %v5316_v7, 1 }
 0x107   : > { %3134 = vperm.xlu0 %4664, %v3092_v23   ;;  %v3110_v23 = vld [vmem:[#allocation7 + $0x98] sm:$0xff] }
 0x108   : > { %4010 = vmatmul.mubr.msk.bf16.gmra.mrb[32].mxu1 %vm525_vm2, %v5356_v61 }
 0x109   : > { %4015 = vmatprep.mubr.msk.bf16.mxu1 %vm525_vm2, %v982_v32  ;;  %v1005_v32 = vrot.slane %v5284_v33, 1 }
 0x10a   : > { %4180 = vmatmul.mubr.msk.bf16.gmra.mrb[12].mxu0 %vm525_vm2, %v5469_v45  ;;  %v5648_v45 = vsel %vm979_vm6, %v985_v3, %v987_v12  ;;  %v3107_v3 = vld [vmem:[#allocation7 + $0x80] sm:$0xff] }
 0x10b   : > { %4183 = vmatprep.mubr.msk.bf16.mxu0 %vm525_vm2, %v5494_v0  ;;  %v3094_v0 = vld [vmem:[#allocation7 + $0x18] sm:$0xff] }
 0x10c   : > { %3144 = vperm.xlu1 %4665, %v3094_v0   ;;  %v3112_v0 = vld [vmem:[#allocation7 + $0xa8] sm:$0xff] }
 0x110   : > { %4016 = vmatmul.mubr.msk.bf16.vlgmr.msra.gmra.mrb[0].mxu1 %vm525_vm2, %v5628_v6  ;;  %3154 = vperm.xlu1 %4665, %v3096_v15   ;;  %v3114_v15 = vld [vmem:[#allocation7 + $0xb8] sm:$0xff] }
 0x111   : > { %4019 = vmatprep.mubr.msk.bf16.mxu1 %vm525_vm2, %v5631_v38  ;;  %4052 = vmatpush3.bf16.msra.mxu1 %v1306_v11  ;;  %v3108_v11 = vld [vmem:[#allocation7 + $0x88] sm:$0xff] }
 0x112   : > { %4574 = vmatprep.subr.msk.bf16.mxu1 %vm580_vm0, %v5084_v1  ;;  %4184 = vmatmul.mubr.msk.bf16.gmra.mrb[16].mxu0 %vm525_vm2, %v5499_v62  ;;  %v991_v1 = vrot.slane %v5150_v42, 1  ;;  %v3095_v62 = vld [vmem:[#allocation7 + $0x20] sm:$0xff]  ;;  %v3097_v42 = vld [vmem:[#allocation7 + $0x30] sm:$0xff] }
 0x113   : > { %4187 = vmatprep.mubr.msk.bf16.mxu0 %vm525_vm2, %v5522_v35  ;;  %3149 = vperm.xlu0 %4664, %v3095_v62   ;;  %v3099_v35 = vld [vmem:[#allocation7 + $0x40] sm:$0xff]  ;;  %v3113_v62 = vld [vmem:[#allocation7 + $0xb0] sm:$0xff] }
 0x114   : > { %v5664_v4 = vsel %vm979_vm6, %v989_v22, %v991_v1  ;;  %v5667_v25 = vsel %vm979_vm6, %v991_v1, %v993_v29  ;;  %3164 = vperm.xlu1 %4665, %v3098_v48   ;;  %v3109_v22 = vld [vmem:[#allocation7 + $0x90] sm:$0xff]  ;;  %v3111_v1 = vld [vmem:[#allocation7 + $0xa0] sm:$0xff]  ;;  %v3116_v48 = vld [vmem:[#allocation7 + $0xc8] sm:$0xff] }
 0x117   : > { %3159 = vperm.xlu0 %4664, %v3097_v42   ;;  %v3115_v42 = vld [vmem:[#allocation7 + $0xc0] sm:$0xff] }
 0x118   : > { %4020 = vmatmul.mubr.msk.bf16.gmra.mrb[4].mxu1 %vm525_vm2, %v5648_v45  ;;  %3174 = vperm.xlu1 %4665, %v3100_v44  }
 0x119   : > { %4023 = vmatprep.mubr.msk.bf16.mxu1 %vm525_vm2, %v5651_v40 }
 0x11a   : > { %4188 = vmatmul.mubr.msk.bf16.gmra.mrb[20].mxu0 %vm525_vm2, %v5529_v59  ;;  %v5680_v59 = vsel %vm979_vm6, %v993_v29, %v995_v47 }
 0x11b   : > { %4191 = vmatprep.mubr.msk.bf16.mxu0 %vm525_vm2, %v5544_v17  ;;  %3169 = vperm.xlu0 %4664, %v3099_v35   ;;  %v999_v17 = vrot.slane %v5208_v20, 1  ;;  %v3117_v35 = vld [vmem:[#allocation7 + $0xd0] sm:$0xff] }
 0x11c   : > { %3184 = vperm.xlu1 %4665, %v3102_v37   ;;  %v3119_v37 = vld [vmem:[#allocation7 + $0xe0] sm:$0xff] }
 0x11d   : > { %v5700_v24 = vsel %vm979_vm6, %v997_v2, %v999_v17 }
 0x11f   : > { %3179 = vperm.xlu0 %4664, %v3101_v60   ;;  %v6154_v60 = vld [vmem:[#allocation16_spill] sm:$0xff] }
 0x120   : > { %4024 = vmatmul.mubr.msk.bf16.gmra.mrb[8].mxu1 %vm525_vm2, %v5664_v4  ;;  %3194 = vperm.xlu1 %4665, %v3104_v27   ;;  %v3121_v27 = vld [vmem:[#allocation7 + $0xf0] sm:$0xff] }
 0x121   : > { %4027 = vmatprep.mubr.msk.bf16.mxu1 %vm525_vm2, %v5667_v25 }
 0x122   : > { %4192 = vmatmul.mubr.msk.bf16.gmra.mrb[24].mxu0 %vm525_vm2, %v5549_v16  ;;  %v1001_v16 = vrot.slane %v5247_v52, 1 }
 0x123   : > { %4195 = vmatprep.mubr.msk.bf16.mxu0 %vm525_vm2, %v5559_v54  ;;  %v3103_v54 = vld [vmem:[#allocation7 + $0x60] sm:$0xff] }
 0x124   : > { %3189 = vperm.xlu0 %4664, %v3103_v54   ;;  %v5703_v20 = vsel %vm979_vm6, %v999_v17, %v1001_v16  ;;  %3204 = vperm.xlu1 %4665, %v3106_v53   ;;  %v2462_v17 = vrot.slane %v6154_v60, 3  ;;  %v6158_v53 = vld [vmem:[#allocation21_spill] sm:$0xff] }
 0x128   : > { %4028 = vmatmul.mubr.msk.bf16.gmra.mrb[12].mxu1 %vm525_vm2, %v5680_v59  ;;  %3199 = vperm.xlu0 %4664, %v3105_v34   ;;  %v6155_v34 = vld [vmem:[#allocation20_spill] sm:$0xff] }
 0x129   : > { %4031 = vmatprep.mubr.msk.bf16.mxu1 %vm525_vm2, %v5683_v56  ;;  %3214 = vperm.xlu1 %4665, %v3108_v11   ;;  %v3122_v11 = vld [vmem:[#allocation7 + $0xf8] sm:$0xff] }
 0x12a   : > { %4196 = vmatmul.mubr.msk.bf16.gmra.mrb[28].mxu0 %vm525_vm2, %v5569_v8  ;;  %v6152_v8 = vrot.slane %v5378_v30, 2 }
 0x12b   : > { %4199 = vmatprep.mubr.msk.bf16.mxu0 %vm525_vm2, %v5405_v57  ;;  %v1003_v57 = vrot.slane %v5276_v26, 1 }
 0x12c   : > { %v2200_v18 = vsel %vm1881_vm4, %v6152_v8, %v2199_v5  ;;  %3209 = vperm.xlu0 %4664, %v3107_v3   ;;  %v2465_v8 = vrot.slane %v6155_v34, 2  ;;  %v2470_v3 = vrot.slane %v6158_v53, 3 }
 0x12d   : > { %v5718_v14 = vsel %vm979_vm6, %v1001_v16, %v1003_v57  ;;  %v5721_v12 = vsel %vm979_vm6, %v1003_v57, %v1005_v32  ;;  %3224 = vperm.xlu1 %4665, %v3110_v23   ;;  %v3118_v16 = vld [vmem:[#allocation7 + $0xd8] sm:$0xff]  ;;  %v6159_v23 = vld [vmem:[#allocation24_spill] sm:$0xff] }
 0x130   : > { %4032 = vmatmul.mubr.msk.bf16.gmra.mrb[16].mxu1 %vm525_vm2, %v5700_v24  ;;  %3219 = vperm.xlu0 %4664, %v3109_v22   ;;  %v3123_v22 = vld [vmem:[#allocation7 + $0x100] sm:$0xff] }
 0x131   : > { %4035 = vmatprep.mubr.msk.bf16.mxu1 %vm525_vm2, %v5703_v20  ;;  %3234 = vperm.xlu1 %4665, %v3112_v0   ;;  %v6160_v0 = vld [vmem:[#allocation22_spill] sm:$0xff] }
 0x132   : > { %4200 = vmatmul.mubr.msk.bf16.gmra.mrb[32].mxu0 %vm525_vm2, %v2200_v18  ;;  %v6156_v18 = vld [vmem:[#allocation19_spill] sm:$0xff] }
 0x133   : > { %4205 = vmatprep.mubr.msk.bf16.mxu0 %vm525_vm2, %v5438_v21  ;;  %v1007_v21 = vrot.slane %v5308_v55, 1  ;;  %v2466_v57 = vrot.slane %v6156_v18, 3 }
 0x134   : > { %3229 = vperm.xlu0 %4664, %v3111_v1   ;;  %v2473_v1 = vrot.slane %v6159_v23, 2 }
 0x135   : > { %v5736_v29 = vsel %vm979_vm6, %v1005_v32, %v1007_v21  ;;  %v5739_v9 = vsel %vm979_vm6, %v1007_v21, %v1009_v28  ;;  %3244 = vperm.xlu1 %4665, %v3114_v15   ;;  %v6162_v15 = vld [vmem:[#allocation27_spill] sm:$0xff] }
 0x138   : > { %4036 = vmatmul.mubr.msk.bf16.gmra.mrb[20].mxu1 %vm525_vm2, %v5718_v14  ;;  %3239 = vperm.xlu0 %4664, %v3113_v62   ;;  %v2474_v62 = vrot.slane %v6160_v0, 3 }
 0x139   : > { %4039 = vmatprep.mubr.msk.bf16.mxu1 %vm525_vm2, %v5721_v12  ;;  %3254 = vperm.xlu1 %4665, %v3116_v48   ;;  %v6163_v48 = vld [vmem:[#allocation25_spill] sm:$0xff] }
 0x13a   : > { %4206 = vmatmul.mubr.msk.bf16.vlgmr.msra.gmra.mrb[0].mxu0 %vm525_vm2, %v5446_v41  ;;  %v1011_v41 = vrot.slane %v5343_v43, 1 }
 0x13b   : > { %4242 = vmatpush3.bf16.msra.mxu0 %v2876_v31  ;;  %4209 = vmatprep.mubr.msk.bf16.mxu0 %vm525_vm2, %v5464_v63  ;;  %v5747_v63 = vrot.slane %v5356_v61, 1  ;;  %v2467_v31 = vor.u32 %v2466_v57, %v2465_v8 }
 0x13c   : > { %v5754_v47 = vsel %vm979_vm6, %v1009_v28, %v1011_v41  ;;  %3249 = vperm.xlu0 %4664, %v3115_v42   ;;  %v3125_v28 = vld [vmem:[#allocation7 + $0x110] sm:$0xff]  ;;  %v2477_v42 = vrot.slane %v6162_v15, 2 }
 0x13d   : > { %v5758_v2 = vsel %vm979_vm6, %v1011_v41, %v5747_v63  ;;  %3264 = vperm.xlu1 %4665, %v3118_v16   ;;  %v6161_v41 = vld [vmem:[#allocation15_spill] sm:$0xff] }
 0x140   : > { %4040 = vmatmul.mubr.msk.bf16.gmra.mrb[24].mxu1 %vm525_vm2, %v5736_v29  ;;  %3259 = vperm.xlu0 %4664, %v3117_v35   ;;  %v2478_v35 = vrot.slane %v6163_v48, 3 }
 0x141   : > { %4043 = vmatprep.mubr.msk.bf16.mxu1 %vm525_vm2, %v5739_v9 }
 0x142   : > { %4210 = vmatmul.mubr.msk.bf16.gmra.mrb[4].mxu0 %vm525_vm2, %v5474_v58  ;;  %v1015_v58 = vrot.slane %v5411_v50, 1  ;;  %v3120_v50 = vld [vmem:[#allocation7 + $0xe8] sm:$0xff] }
 0x143   : > { %4213 = vmatprep.mubr.msk.bf16.mxu0 %vm525_vm2, %v5489_v10  ;;  %v6153_v10 = vld [vmem:[#allocation17_spill] sm:$0xff]  ;;  %3274 = vperm.xlu1 %4665, %v3120_v50  }
 0x144   : > { %v2461_v44 = vrot.slane %v6153_v10, 2  ;;  %v1016_v54 = vsel %vm979_vm6, %v5747_v63, %v1015_v58  ;;  %3269 = vperm.xlu0 %4664, %v3119_v37   ;;  %v2475_v58 = vor.u32 %v2474_v62, %v2473_v1  ;;  %v2479_v10 = vor.u32 %v2478_v35, %v2477_v42  ;;  %v4689_v35 = vld [vmem:[%s5072_s27 + $0x10] sm:$0xff]  }
 0x146   : > { %v2463_v5 = vor.u32 %v2462_v17, %v2461_v44  ;;  %v6164_v44 = vld [vmem:[#allocation29_spill] sm:$0xff]  ;;  %v6165_v17 = vld [vmem:[#allocation28_spill] sm:$0xff]  ;;  %v2480_v37 = vsel %vm2425_vm5, %v2475_v58, %v2479_v10 }
 0x147   : > { %3284 = vperm.xlu1 %4665, %v3122_v11   ;;  %v2481_v60 = vrot.slane %v6164_v44, 2  ;;  %v2482_v16 = vrot.slane %v6165_v17, 3 }
 0x148   : > { %4044 = vmatmul.mubr.msk.bf16.gmra.mrb[28].mxu1 %vm525_vm2, %v5754_v47  ;;  %3279 = vperm.xlu0 %4664, %v3121_v27   ;;  %v6167_v27 = vld [vmem:[#allocation26_spill] sm:$0xff] }
 0x149   : > { %4047 = vmatprep.mubr.msk.bf16.mxu1 %vm525_vm2, %v5758_v2  ;;  %v1592_v8 = vshrl.u32 %v6167_v27, 16  ;;  %v1595_v57 = vshll.u32 %v6167_v27, 16 }
 0x14a   : > { %4214 = vmatmul.mubr.msk.bf16.gmra.mrb[8].mxu0 %vm525_vm2, %v5504_v19  ;;  %v2464_v19 = vsel %vm2425_vm5, %v5524_v36, %v2463_v5  ;;  %v2468_v36 = vsel %vm2425_vm5, %v2463_v5, %v2467_v31  ;;  %v6166_v5 = vld [vmem:[#allocation30_spill] sm:$0xff] }
 0x14b   : > { %4217 = vmatprep.mubr.msk.bf16.mxu0 %vm525_vm2, %v5517_v46  ;;  %v6157_v46 = vld [vmem:[#allocation23_spill] sm:$0xff]  ;;  %v2486_v50 = vrot.slane %v6166_v5, 3  ;;  %v2489_v11 = vrot.slane %v1592_v8, 2 }
 0x14c   : > { %v2469_v32 = vrot.slane %v6157_v46, 2  ;;  %3289 = vperm.xlu0 %4664, %v3123_v22   ;;  %v2490_v22 = vrot.slane %v1595_v57, 3 }
 0x14e   : > { %v2471_v21 = vor.u32 %v2470_v3, %v2469_v32  ;;  %v2494_v32 = vshrl.u32 %v5378_v30, 16 }
 0x150   : > { %4048 = vmatmul.mubr.msk.bf16.gmra.mrb[32].mxu1 %vm525_vm2, %v1016_v54  ;;  %3299 = vperm.xlu0 %4664, %v3125_v28   ;;  %v2485_v54 = vrot.slane %v5427_v49, 2  ;;  %v2503_v28 = vshrl.u32 %v5688_v13, 16 }
 0x151   : > { %4053 = vmatprep.mubr.msk.bf16.mxu1 %vm525_vm2, %v5628_v6  ;;  %v3124_v6 = vld [vmem:[#allocation7 + $0x108] sm:$0xff] }
 0x152   : > { %4218 = vmatmul.mubr.msk.bf16.gmra.mrb[12].mxu0 %vm525_vm2, %v5533_v39  ;;  %v2472_v39 = vsel %vm2425_vm5, %v2467_v31, %v2471_v21  ;;  %3294 = vperm.xlu1 %4665, %v3124_v6   ;;  %v2505_v62 = vrot.slane %v2503_v28, 2 }
 0x153   : > { %4221 = vmatprep.mubr.msk.bf16.mxu0 %vm525_vm2, %v2464_v19  ;;  %v2487_v19 = vor.u32 %v2486_v50, %v2485_v54  ;;  %v4693_v54 = vld [vmem:[%s5072_s27 + $0x30] sm:$0xff]  }
 0x154   : > { %v2791_v50 = vrot.slane %v4693_v54, 3 }
 0x158   : > { %4054 = vmatmul.mubr.msk.bf16.vlgmr.msra.gmra.mrb[0].mxu1 %vm525_vm2, %v5631_v38  ;;  %v3126_v38 = vld [vmem:[#allocation7 + $0x118] sm:$0xff] }
 0x159   : > { %4057 = vmatprep.mubr.msk.bf16.mxu1 %vm525_vm2, %v5648_v45  ;;  %4280 = vmatpush3.bf16.msra.mxu1 %v6161_v41  ;;  %v2476_v45 = vsel %vm2425_vm5, %v2471_v21, %v2475_v58  ;;  %v2496_v21 = vrot.slane %v2494_v32, 2  ;;  %v4690_v58 = vld [vmem:[%s5072_s27 + $0x18] sm:$0xff]   ;;  %v1295_v32 = vrot.slane %v6167_v27, 1 }
 0x15a   : > { %4222 = vmatmul.mubr.msk.bf16.gmra.mrb[16].mxu0 %vm525_vm2, %v2468_v36  ;;  %3304 = vperm.xlu1 %4665, %v3126_v38   ;;  %v2506_v36 = vshll.u32 %v5688_v13, 16  ;;  %v2784_v38 = vrot.slane %v4689_v35, 3 }
 0x15b   : > { %4225 = vmatprep.mubr.msk.bf16.mxu0 %vm525_vm2, %v2472_v39 }
 0x15c   : > { %v2508_v39 = vrot.slane %v2506_v36, 3  ;;  %v2801_v36 = vrot.slane %v5247_v52, 3 }
 0x15e   : > { %v2509_v42 = vor.u32 %v2508_v39, %v2505_v62  ;;  %v1575_v39 = vrot.slane %v6159_v23, 1  ;;  %v2805_v23 = vrot.slane %v5284_v33, 3 }
 0x160   : > { %4058 = vmatmul.mubr.msk.bf16.gmra.mrb[4].mxu1 %vm525_vm2, %v5651_v40  ;;  %v2483_v40 = vor.u32 %v2482_v16, %v2481_v60  ;;  %v4692_v16 = vld [vmem:[%s5072_s27 + $0x28] sm:$0xff]  }
 0x161   : > { %4061 = vmatprep.mubr.msk.bf16.mxu1 %vm525_vm2, %v5664_v4  ;;  %v2497_v4 = vshll.u32 %v5378_v30, 16 }
 0x162   : > { %4226 = vmatmul.mubr.msk.bf16.gmra.mrb[20].mxu0 %vm525_vm2, %v2476_v45  ;;  %v2484_v3 = vsel %vm2425_vm5, %v2479_v10, %v2483_v40  ;;  %v2488_v31 = vsel %vm2425_vm5, %v2483_v40, %v2487_v19  ;;  %v4691_v45 = vld [vmem:[%s5072_s27 + $0x20] sm:$0xff]   ;;  %v4694_v40 = vld [vmem:[%s5072_s27 + $0x38] sm:$0xff]  }
 0x163   : > { %4229 = vmatprep.mubr.msk.bf16.mxu0 %vm525_vm2, %v2480_v37  ;;  %v2499_v6 = vrot.slane %v2497_v4, 3  ;;  %v2787_v60 = vrot.slane %v4691_v45, 3  ;;  %v2789_v37 = vrot.slane %v4692_v16, 3  ;;  %v4695_v4 = vld [vmem:[%s5072_s27 + $0x40] sm:$0xff]   ;;  %v1588_v16 = vrot.slane %v6166_v5, 2 }
 0x164   : > { %v1604_v5 = vshll.u32 %v5563_v51, 16 }
 0x165   : > { %v2500_v1 = vor.u32 %v2499_v6, %v2496_v21 }
 0x168   : > { %4062 = vmatmul.mubr.msk.bf16.gmra.mrb[8].mxu1 %vm525_vm2, %v5667_v25  ;;  %v2491_v25 = vor.u32 %v2490_v22, %v2489_v11  ;;  %v4696_v11 = vld [vmem:[%s5072_s27 + $0x48] sm:$0xff]  }
 0x169   : > { %4065 = vmatprep.mubr.msk.bf16.mxu1 %vm525_vm2, %v5680_v59  ;;  %v2797_v22 = vrot.slane %v4696_v11, 3 }
 0x16a   : > { %4230 = vmatmul.mubr.msk.bf16.gmra.mrb[24].mxu0 %vm525_vm2, %v2484_v3  ;;  %v2492_v59 = vsel %vm2425_vm5, %v2487_v19, %v2491_v25  ;;  %v2501_v41 = vsel %vm2425_vm5, %v2491_v25, %v2500_v1  ;;  %v2793_v19 = vrot.slane %v4694_v40, 3  ;;  %v2795_v3 = vrot.slane %v4695_v4, 3 }
 0x16b   : > { %4233 = vmatprep.mubr.msk.bf16.mxu0 %vm525_vm2, %v2488_v31  ;;  %v1567_v31 = vrot.slane %v6155_v34, 1  ;;  %v1297_v25 = vrot.slane %v5563_v51, 1  ;;  %v2813_v40 = vrot.slane %v5356_v61, 3 }
 0x16c   : > { %v2796_v21 = vsel %vm2783_vm7, %v2793_v19, %v2795_v3  ;;  %v2798_v6 = vsel %vm2783_vm7, %v2795_v3, %v2797_v22  ;;  %v2817_v3 = vrot.slane %v5378_v30, 3 }
 0x170   : > { %4066 = vmatmul.mubr.msk.bf16.gmra.mrb[12].mxu1 %vm525_vm2, %v5683_v56  ;;  %v2785_v56 = vrot.slane %v4690_v58, 3  ;;  %v1580_v58 = vrot.slane %v6163_v48, 2 }
 0x171   : > { %4069 = vmatprep.mubr.msk.bf16.mxu1 %vm525_vm2, %v5700_v24  ;;  %v2510_v24 = vsel %vm2425_vm5, %v2500_v1, %v2509_v42  ;;  %v1572_v1 = vrot.slane %v6158_v53, 2 }
 0x172   : > { %4234 = vmatmul.mubr.msk.bf16.gmra.mrb[28].mxu0 %vm525_vm2, %v2492_v59  ;;  %v2786_v10 = vsel %vm2783_vm7, %v2784_v38, %v2785_v56  ;;  %v6168_v59 = vld [vmem:[#allocation18_spill] sm:$0xff] }
 0x173   : > { %4237 = vmatprep.mubr.msk.bf16.mxu0 %vm525_vm2, %v2501_v41  ;;  %v1576_v41 = vrot.slane %v6160_v0, 2  ;;  %v1579_v0 = vrot.slane %v6162_v15, 1  ;;  %v2807_v15 = vrot.slane %v5308_v55, 3 }
 0x175   : > { %v1577_v38 = vor.u32 %v1576_v41, %v1575_v39  ;;  %v2808_v55 = vsel %vm2783_vm7, %v2805_v23, %v2807_v15 }
 0x178   : > { %4070 = vmatmul.mubr.msk.bf16.gmra.mrb[16].mxu1 %vm525_vm2, %v5703_v20  ;;  %v2788_v20 = vsel %vm2783_vm7, %v2785_v56, %v2787_v60 }
 0x179   : > { %4073 = vmatprep.mubr.msk.bf16.mxu1 %vm525_vm2, %v5718_v14  ;;  %v2790_v14 = vsel %vm2783_vm7, %v2787_v60, %v2789_v37  ;;  %v1581_v60 = vor.u32 %v1580_v58, %v1579_v0 }
 0x17a   : > { %4238 = vmatmul.mubr.msk.bf16.gmra.mrb[32].mxu0 %vm525_vm2, %v2510_v24  ;;  %v1583_v24 = vrot.slane %v6164_v44, 1  ;;  %v2809_v44 = vrot.slane %v5316_v7, 3 }
 0x17b   : > { %4243 = vmatprep.mubr.msk.bf16.mxu0 %vm525_vm2, %v2786_v10  ;;  %v1584_v10 = vrot.slane %v6165_v17, 2  ;;  %v1582_v48 = vsel %vm1523_vm3, %v1577_v38, %v1581_v60  ;;  %v1587_v17 = vrot.slane %v5427_v49, 1  ;;  %v1601_v49 = vshrl.u32 %v5563_v51, 16 }
 0x17c   : > { %v2810_v7 = vsel %vm2783_vm7, %v2807_v15, %v2809_v44 }
 0x17d   : > { %v1585_v33 = vor.u32 %v1584_v10, %v1583_v24  ;;  %v1589_v54 = vor.u32 %v1588_v16, %v1587_v17 }
 0x180   : > { %4074 = vmatmul.mubr.msk.bf16.gmra.mrb[20].mxu1 %vm525_vm2, %v5721_v12  ;;  %v2792_v12 = vsel %vm2783_vm7, %v2789_v37, %v2791_v50  ;;  %v1586_v37 = vsel %vm1523_vm3, %v1581_v60, %v1585_v33 }
 0x181   : > { %4077 = vmatprep.mubr.msk.bf16.mxu1 %vm525_vm2, %v5736_v29  ;;  %v2794_v29 = vsel %vm2783_vm7, %v2791_v50, %v2793_v19  ;;  %v1603_v19 = vrot.slane %v1601_v49, 1 }
 0x182   : > { %4244 = vmatmul.mubr.msk.bf16.vlgmr.msra.gmra.mrb[0].mxu0 %vm525_vm2, %v2788_v20  ;;  %v1594_v20 = vrot.slane %v1592_v8, 1  ;;  %v2811_v8 = vrot.slane %v5343_v43, 3  ;;  %v2815_v43 = vrot.slane %v6167_v27, 3 }
 0x183   : > { %4247 = vmatprep.mubr.msk.bf16.mxu0 %vm525_vm2, %v2790_v14  ;;  %v1597_v14 = vrot.slane %v1595_v57, 2  ;;  %v1590_v57 = vsel %vm1523_vm3, %v1585_v33, %v1589_v54 }
 0x184   : > { %v2814_v51 = vsel %vm2783_vm7, %v2811_v8, %v2813_v40  ;;  %v2816_v11 = vsel %vm2783_vm7, %v2813_v40, %v2815_v43 }
 0x185   : > { %v1598_v50 = vor.u32 %v1597_v14, %v1594_v20 }
 0x188   : > { %4078 = vmatmul.mubr.msk.bf16.gmra.mrb[24].mxu1 %vm525_vm2, %v5739_v9  ;;  %v1296_v9 = vsel %vm979_vm6, %v5747_v63, %v1295_v32  ;;  %v4697_v63 = vld [vmem:[%s5072_s27 + $0x50] sm:$0xff]  }
 0x189   : > { %4081 = vmatprep.mubr.msk.bf16.mxu1 %vm525_vm2, %v5754_v47  ;;  %v1568_v47 = vrot.slane %v6156_v18, 2  ;;  %v2799_v34 = vrot.slane %v4697_v63, 3  ;;  %v1298_v18 = vsel %vm979_vm6, %v1295_v32, %v1297_v25  ;;  %v2812_v32 = vsel %vm2783_vm7, %v2809_v44, %v2811_v8 }
 0x18a   : > { %4248 = vmatmul.mubr.msk.bf16.gmra.mrb[4].mxu0 %vm525_vm2, %v2792_v12  ;;  %v1606_v12 = vrot.slane %v1604_v5, 2 }
 0x18b   : > { %4251 = vmatprep.mubr.msk.bf16.mxu0 %vm525_vm2, %v2794_v29  ;;  %v1569_v28 = vor.u32 %v1568_v47, %v1567_v31  ;;  %v2800_v42 = vsel %vm2783_vm7, %v2797_v22, %v2799_v34  ;;  %v2802_v35 = vsel %vm2783_vm7, %v2799_v34, %v2801_v36  ;;  %v1599_v29 = vsel %vm1523_vm3, %v1589_v54, %v1598_v50 }
 0x18c   : > { %v1607_v4 = vor.u32 %v1606_v12, %v1603_v19  ;;  %v2818_v22 = vsel %vm2783_vm7, %v2815_v43, %v2817_v3 }
 0x18d   : > { %v1570_v62 = vsel %vm1523_vm3, %v6168_v59, %v1569_v28 }
 0x18e   : > { %v1608_v61 = vsel %vm1523_vm3, %v1598_v50, %v1607_v4 }
 0x190   : > { %4082 = vmatmul.mubr.msk.bf16.gmra.mrb[28].mxu1 %vm525_vm2, %v5758_v2  ;;  %v1571_v2 = vrot.slane %v6157_v46, 1  ;;  %v2803_v46 = vrot.slane %v5276_v26, 3 }
 0x191   : > { %4085 = vmatprep.mubr.msk.bf16.mxu1 %vm525_vm2, %v1296_v9  ;;  %v2819_v9 = vrot.slane %v5688_v13, 3 }
 0x192   : > { %4252 = vmatmul.mubr.msk.bf16.gmra.mrb[8].mxu0 %vm525_vm2, %v2796_v21  ;;  %v1573_v52 = vor.u32 %v1572_v1, %v1571_v2  ;;  %v2804_v45 = vsel %vm2783_vm7, %v2801_v36, %v2803_v46  ;;  %v2806_v26 = vsel %vm2783_vm7, %v2803_v46, %v2805_v23 }
 0x193   : > { %4255 = vmatprep.mubr.msk.bf16.mxu0 %vm525_vm2, %v2798_v6  ;;  %v2820_v31 = vsel %vm2783_vm7, %v2817_v3, %v2819_v9  ;;  %v3130_v6 = vpop.permute.xlu0 %3129 }
 0x194   : > { %v1574_v53 = vsel %vm1523_vm3, %v1569_v28, %v1573_v52  ;;  %v1578_v56 = vsel %vm1523_vm3, %v1573_v52, %v1577_v38 }
 0x197   : > { %v3135_v36 = vpop.permute.xlu0 %3134 }
 0x198   : > { %4086 = vmatmul.mubr.msk.bf16.gmra.mrb[32].mxu1 %vm525_vm2, %v1298_v18  ;;  %v3140_v18 = vpop.permute.xlu1 %3139 }
 0x199   : > { %4111 = vmatprep.mubr.msk.bf16.mxu1 %vm525_vm2, %v1570_v62 }
 0x19a   : > { %4256 = vmatmul.mubr.msk.bf16.gmra.mrb[12].mxu0 %vm525_vm2, %v2800_v42 }
 0x19b   : > { %4259 = vmatprep.mubr.msk.bf16.mxu0 %vm525_vm2, %v2802_v35  ;;  %v3150_v39 = vpop.permute.xlu0 %3149 }
 0x19c   : > { %v3145_v13 = vpop.permute.xlu1 %3144 }
 0x19f   : > { %v3160_v52 = vpop.permute.xlu0 %3159 }
 0x1a0   : > { %4112 = vmatmul.mubr.msk.bf16.vlgmr.msra.gmra.mrb[20].mxu1 %vm525_vm2, %v1574_v53  ;;  %v3155_v41 = vpop.permute.xlu1 %3154 }
 0x1a1   : > { %4115 = vmatprep.mubr.msk.bf16.mxu1 %vm525_vm2, %v1578_v56 }
 0x1a2   : > { %4260 = vmatmul.mubr.msk.bf16.gmra.mrb[16].mxu0 %vm525_vm2, %v2804_v45 }
 0x1a3   : > { %4263 = vmatprep.mubr.msk.bf16.mxu0 %vm525_vm2, %v2806_v26  ;;  %v5965_v23 = vpop.permute.xlu0 %3169 }
 0x1a4   : > { %v3165_v53 = vpop.permute.xlu1 %3164 }
 0x1a7   : > { %v5977_v45 = vpop.permute.xlu0 %3179 }
 0x1a8   : > { %4116 = vmatmul.mubr.msk.bf16.gmra.mrb[24].mxu1 %vm525_vm2, %v1582_v48  ;;  %v5975_v10 = vpop.permute.xlu1 %3174 }
 0x1a9   : > { %4119 = vmatprep.mubr.msk.bf16.mxu1 %vm525_vm2, %v1586_v37 }
 0x1aa   : > { %4264 = vmatmul.mubr.msk.bf16.gmra.mrb[20].mxu0 %vm525_vm2, %v2808_v55 }
 0x1ab   : > { %4267 = vmatprep.mubr.msk.bf16.mxu0 %vm525_vm2, %v2810_v7  ;;  %v5981_v33 = vpop.permute.xlu0 %3189 }
 0x1ac   : > { %v5979_v26 = vpop.permute.xlu1 %3184 }
 0x1af   : > { %v5985_v49 = vpop.permute.xlu0 %3199 }
 0x1b0   : > { %4120 = vmatmul.mubr.msk.bf16.gmra.mrb[28].mxu1 %vm525_vm2, %v1590_v57  ;;  %v5983_v55 = vpop.permute.xlu1 %3194 }
 0x1b1   : > { %4123 = vmatprep.mubr.msk.bf16.mxu1 %vm525_vm2, %v1599_v29 }
 0x1b2   : > { %4268 = vmatmul.mubr.msk.bf16.gmra.mrb[24].mxu0 %vm525_vm2, %v2812_v32 }
 0x1b3   : > { %4271 = vmatprep.mubr.msk.bf16.mxu0 %vm525_vm2, %v2814_v51 }
 0x1b8   : > { %4124 = vmatmul.mubr.msk.bf16.gmra.mrb[32].mxu1 %vm525_vm2, %v1608_v61  ;;  %v5987_v61 = vpop.permute.xlu1 %3204 }
 0x1ba   : > { %4272 = vmatmul.mubr.msk.bf16.gmra.mrb[28].mxu0 %vm525_vm2, %v2816_v11 }
 0x1bb   : > { %4275 = vmatprep.mubr.msk.bf16.mxu0 %vm525_vm2, %v2818_v22 }
 0x1c2   : > { %4276 = vmatmul.mubr.msk.bf16.gmra.mrb[32].mxu0 %vm525_vm2, %v2820_v31 }
 0x22b   : > { %v4055_v27 = vpop.f32.mrb[0].mxu1 }
 0x22c   : > { %v1342_v47 = vpop.f32.mrb[1].mxu1 }
 0x22d   : > { %v4056_v21 = vpop.f32.mrb[2].mxu1 }
 0x22e   : > { %v1345_v30 = vpop.f32.mrb[3].mxu1 }
 0x233   : > { %v4059_v25 = vpop.f32.mrb[4].mxu1 }
 0x234   : > { %v1358_v28 = vpop.f32.mrb[5].mxu1 }
 0x235   : > { %v4060_v63 = vpop.f32.mrb[6].mxu1 }
 0x236   : > { %v1361_v34 = vpop.f32.mrb[7].mxu1 }
 0x23b   : > { %v5949_v2 = vpop.f32.mrb[8].mxu1 }
 0x23c   : > { %v5951_v1 = vpop.f32.mrb[9].mxu1 }
 0x23d   : > { %v5953_v59 = vpop.f32.mrb[10].mxu1 }
 0x23e   : > { %v5955_v62 = vpop.f32.mrb[11].mxu1 }
 0x243   : > { %v5957_v42 = vpop.f32.mrb[12].mxu1 }
 0x244   : > { %v5959_v35 = vpop.f32.mrb[13].mxu1 }
 0x245   : > { %v5961_v38 = vpop.f32.mrb[14].mxu1 }
 0x246   : > { %v5963_v46 = vpop.f32.mrb[15].mxu1 }
 0x24b   : > { %v5967_v0 = vpop.f32.mrb[16].mxu1 }
 0x24c   : > { %v5969_v58 = vpop.f32.mrb[17].mxu1 }
 0x24d   : > { %v5971_v56 = vpop.f32.mrb[18].mxu1 }
 0x24e   : > { %v5973_v24 = vpop.f32.mrb[19].mxu1 }
 0x255   : > { %v4245_v60 = vpop.f32.mrb[0].mxu0 }
 0x256   : > { %v4281_v15 = vadd.f32 %v4245_v60, %v4055_v27  ;;  %v2912_v48 = vpop.f32.mrb[1].mxu0 }
 0x257   : > { %v4282_v44 = vadd.f32 %v2912_v48, %v1342_v47  ;;  %v4246_v17 = vpop.f32.mrb[2].mxu0 }
 0x258   : > { %v4283_v16 = vadd.f32 %v4246_v17, %v4056_v21  ;;  %v2915_v37 = vpop.f32.mrb[3].mxu0  ;;  %v3309_v7 = vmul.f32 %v4281_v15, %v3140_v18  ;;  %v5989_v21 = vpop.permute.xlu0 %3209 }
 0x259   : > { %v3307_v20 = vmul.f32 %v4282_v44, %v3130_v6  ;;  %v4284_v14 = vadd.f32 %v2915_v37, %v1345_v30  ;;  %v5991_v44 = vpop.permute.xlu1 %3214 }
 0x25a   : > { %v3310_v5 = vmul.f32 %v4283_v16, %v3145_v13  ;;  %v3390_v29 = vmul.f32 %v3309_v7, %v3309_v7 }
 0x25b   : > { %v3308_v54 = vmul.f32 %v4284_v14, %v3135_v36  ;;  %v3388_v50 = vmul.f32 %v3307_v20, %v3307_v20 }
 0x25c   : > { %v3391_v3 = vmul.f32 %v3310_v5, %v3310_v5 }
 0x25d   : > { %v3344_v8 = vadd.f32 %v3308_v54, %v3307_v20  ;;  %v3389_v57 = vmul.f32 %v3308_v54, %v3308_v54  ;;  %v4249_v40 = vpop.f32.mrb[4].mxu0  ;;  %v5995_v20 = vpop.permute.xlu0 %3219 }
 0x25e   : > { %v4285_v19 = vadd.f32 %v4249_v40, %v4059_v25  ;;  %v2928_v12 = vpop.f32.mrb[5].mxu0 }
 0x25f   : > { %v3345_v32 = vadd.f32 %v3344_v8, %v3309_v7  ;;  %v3424_v51 = vadd.f32 %v3389_v57, %v3388_v50  ;;  %v4286_v4 = vadd.f32 %v2928_v12, %v1358_v28  ;;  %v4250_v43 = vpop.f32.mrb[6].mxu0 }
 0x260   : > { %v4287_v11 = vadd.f32 %v4250_v43, %v4060_v63  ;;  %v2931_v22 = vpop.f32.mrb[7].mxu0  ;;  %v3313_v30 = vmul.f32 %v4285_v19, %v3160_v52  ;;  %v3225_v19 = vpop.permute.xlu1 %3224 }
 0x261   : > { %v3425_v9 = vadd.f32 %v3424_v51, %v3390_v29  ;;  %v3311_v31 = vmul.f32 %v4286_v4, %v3150_v39  ;;  %v3346_v27 = vadd.f32 %v3345_v32, %v3310_v5  ;;  %v4288_v47 = vadd.f32 %v2931_v22, %v1361_v34  ;;  %v6003_v4 = vpop.permute.xlu0 %3229 }
 0x262   : > { %v3314_v13 = vmul.f32 %v4287_v11, %v3165_v53  ;;  %v3394_v39 = vmul.f32 %v3313_v30, %v3313_v30 }
 0x263   : > { %v3347_v6 = vadd.f32 %v3346_v27, %v3311_v31  ;;  %v3392_v25 = vmul.f32 %v3311_v31, %v3311_v31  ;;  %v3426_v18 = vadd.f32 %v3425_v9, %v3391_v3  ;;  %v3312_v36 = vmul.f32 %v4288_v47, %v3155_v41 }
 0x264   : > { %v3395_v14 = vmul.f32 %v3314_v13, %v3314_v13 }
 0x265   : > { %v3427_v60 = vadd.f32 %v3426_v18, %v3392_v25  ;;  %v3348_v28 = vadd.f32 %v3347_v6, %v3312_v36  ;;  %v3393_v15 = vmul.f32 %v3312_v36, %v3312_v36  ;;  %v4253_v48 = vpop.f32.mrb[8].mxu0  ;;  %v6010_v6 = vpop.permute.xlu1 %3234 }
 0x266   : > { %v4289_v63 = vadd.f32 %v4253_v48, %v5949_v2  ;;  %v2944_v17 = vpop.f32.mrb[9].mxu0 }
 0x267   : > { %v3349_v16 = vadd.f32 %v3348_v28, %v3313_v30  ;;  %v3428_v34 = vadd.f32 %v3427_v60, %v3393_v15  ;;  %v4290_v37 = vadd.f32 %v2944_v17, %v5951_v1  ;;  %v4254_v52 = vpop.f32.mrb[10].mxu0  ;;  %v3240_v28 = vpop.permute.xlu0 %3239 }
 0x268   : > { %v4291_v41 = vadd.f32 %v4254_v52, %v5953_v59  ;;  %v2947_v53 = vpop.f32.mrb[11].mxu0  ;;  %v3317_v2 = vmul.f32 %v4289_v63, %v5977_v45 }
 0x269   : > { %v3429_v7 = vadd.f32 %v3428_v34, %v3394_v39  ;;  %v3315_v54 = vmul.f32 %v4290_v37, %v5965_v23  ;;  %v3350_v5 = vadd.f32 %v3349_v16, %v3314_v13  ;;  %v4292_v50 = vadd.f32 %v2947_v53, %v5955_v62 }
 0x26a   : > { %v3318_v12 = vmul.f32 %v4291_v41, %v5979_v26  ;;  %v3398_v62 = vmul.f32 %v3317_v2, %v3317_v2 }
 0x26b   : > { %v3351_v8 = vadd.f32 %v3350_v5, %v3315_v54  ;;  %v3396_v57 = vmul.f32 %v3315_v54, %v3315_v54  ;;  %v3430_v40 = vadd.f32 %v3429_v7, %v3395_v14  ;;  %v3316_v1 = vmul.f32 %v4292_v50, %v5975_v10 }
 0x26c   : > { %v3399_v9 = vmul.f32 %v3318_v12, %v3318_v12 }
 0x26d   : > { %v3431_v29 = vadd.f32 %v3430_v40, %v3396_v57  ;;  %v3352_v32 = vadd.f32 %v3351_v8, %v3316_v1  ;;  %v3397_v59 = vmul.f32 %v3316_v1, %v3316_v1  ;;  %v4257_v51 = vpop.f32.mrb[12].mxu0 }
 0x26e   : > { %v4293_v23 = vadd.f32 %v4257_v51, %v5957_v42  ;;  %v2960_v43 = vpop.f32.mrb[13].mxu0 }
 0x26f   : > { %v3353_v3 = vadd.f32 %v3352_v32, %v3317_v2  ;;  %v3432_v45 = vadd.f32 %v3431_v29, %v3397_v59  ;;  %v4294_v11 = vadd.f32 %v2960_v43, %v5959_v35  ;;  %v4258_v22 = vpop.f32.mrb[14].mxu0  ;;  %v3250_v2 = vpop.permute.xlu0 %3249 }
 0x270   : > { %v4295_v10 = vadd.f32 %v4258_v22, %v5961_v38  ;;  %v2963_v31 = vpop.f32.mrb[15].mxu0  ;;  %v3321_v42 = vmul.f32 %v4293_v23, %v5985_v49 }
 0x271   : > { %v3433_v26 = vadd.f32 %v3432_v45, %v3398_v62  ;;  %v3319_v27 = vmul.f32 %v4294_v11, %v5981_v33  ;;  %v3354_v47 = vadd.f32 %v3353_v3, %v3318_v12  ;;  %v4296_v30 = vadd.f32 %v2963_v31, %v5963_v46 }
 0x272   : > { %v3322_v38 = vmul.f32 %v4295_v10, %v5987_v61  ;;  %v3402_v49 = vmul.f32 %v3321_v42, %v3321_v42 }
 0x273   : > { %v4113_v25 = vpop.f32.mrb[20].mxu1  ;;  %v3355_v18 = vadd.f32 %v3354_v47, %v3319_v27  ;;  %v3400_v36 = vmul.f32 %v3319_v27, %v3319_v27  ;;  %v3434_v13 = vadd.f32 %v3433_v26, %v3399_v9  ;;  %v3320_v35 = vmul.f32 %v4296_v30, %v5983_v55  ;;  %v3245_v55 = vpop.permute.xlu1 %3244 }
 0x274   : > { %v1780_v60 = vpop.f32.mrb[21].mxu1  ;;  %v3403_v41 = vmul.f32 %v3322_v38, %v3322_v38  ;;  %v3260_v9 = vpop.permute.xlu0 %3259 }
 0x275   : > { %v4114_v15 = vpop.f32.mrb[22].mxu1  ;;  %v3435_v48 = vadd.f32 %v3434_v13, %v3400_v36  ;;  %v3356_v33 = vadd.f32 %v3355_v18, %v3320_v35  ;;  %v3401_v63 = vmul.f32 %v3320_v35, %v3320_v35  ;;  %v4261_v17 = vpop.f32.mrb[16].mxu0 }
 0x276   : > { %v1783_v46 = vpop.f32.mrb[23].mxu1  ;;  %v4297_v39 = vadd.f32 %v4261_v17, %v5967_v0  ;;  %v2976_v16 = vpop.f32.mrb[17].mxu0 }
 0x277   : > { %v3357_v34 = vadd.f32 %v3356_v33, %v3321_v42  ;;  %v3436_v37 = vadd.f32 %v3435_v48, %v3401_v63  ;;  %v4298_v52 = vadd.f32 %v2976_v16, %v5969_v58  ;;  %v4262_v14 = vpop.f32.mrb[18].mxu0  ;;  %v3255_v43 = vpop.permute.xlu1 %3254 }
 0x278   : > { %v4299_v53 = vadd.f32 %v4262_v14, %v5971_v56  ;;  %v2979_v61 = vpop.f32.mrb[19].mxu0  ;;  %v3325_v0 = vmul.f32 %v4297_v39, %v5995_v20  ;;  %v3270_v16 = vpop.permute.xlu0 %3269 }
 0x279   : > { %v3437_v7 = vadd.f32 %v3436_v37, %v3402_v49  ;;  %v3323_v54 = vmul.f32 %v4298_v52, %v5989_v21  ;;  %v3358_v5 = vadd.f32 %v3357_v34, %v3322_v38  ;;  %v4300_v50 = vadd.f32 %v2979_v61, %v5973_v24 }
 0x27a   : > { %v3326_v29 = vmul.f32 %v4299_v53, %v3225_v19  ;;  %v3406_v3 = vmul.f32 %v3325_v0, %v3325_v0 }
 0x27b   : > { %v4117_v8 = vpop.f32.mrb[24].mxu1  ;;  %v3359_v57 = vadd.f32 %v3358_v5, %v3323_v54  ;;  %v3404_v40 = vmul.f32 %v3323_v54, %v3323_v54  ;;  %v3438_v1 = vadd.f32 %v3437_v7, %v3403_v41  ;;  %v3324_v58 = vmul.f32 %v4300_v50, %v5991_v44  ;;  %v3265_v38 = vpop.permute.xlu1 %3264 }
 0x27c   : > { %v1796_v12 = vpop.f32.mrb[25].mxu1  ;;  %v3407_v10 = vmul.f32 %v3326_v29, %v3326_v29 }
 0x27d   : > { %v4118_v32 = vpop.f32.mrb[26].mxu1  ;;  %v3439_v56 = vadd.f32 %v3438_v1, %v3404_v40  ;;  %v3360_v59 = vadd.f32 %v3359_v57, %v3324_v58  ;;  %v3405_v51 = vmul.f32 %v3324_v58, %v3324_v58  ;;  %v4265_v23 = vpop.f32.mrb[20].mxu0 }
 0x27e   : > { %v1799_v21 = vpop.f32.mrb[27].mxu1  ;;  %v4301_v62 = vadd.f32 %v4265_v23, %v4113_v25  ;;  %v2992_v24 = vpop.f32.mrb[21].mxu0 }
 0x27f   : > { %v3361_v45 = vadd.f32 %v3360_v59, %v3325_v0  ;;  %v3440_v20 = vadd.f32 %v3439_v56, %v3405_v51  ;;  %v4302_v11 = vadd.f32 %v2992_v24, %v1780_v60  ;;  %v4266_v22 = vpop.f32.mrb[22].mxu0  ;;  %v3275_v54 = vpop.permute.xlu1 %3274 }
 0x280   : > { %v4303_v31 = vadd.f32 %v4266_v22, %v4114_v15  ;;  %v2995_v44 = vpop.f32.mrb[23].mxu0  ;;  %v3329_v30 = vmul.f32 %v4301_v62, %v3240_v28  ;;  %v3280_v58 = vpop.permute.xlu0 %3279 }
 0x281   : > { %v3441_v26 = vadd.f32 %v3440_v20, %v3406_v3  ;;  %v3327_v19 = vmul.f32 %v4302_v11, %v6003_v4  ;;  %v3362_v27 = vadd.f32 %v3361_v45, %v3326_v29  ;;  %v4304_v47 = vadd.f32 %v2995_v44, %v1783_v46 }
 0x282   : > { %v3330_v60 = vmul.f32 %v4303_v31, %v3245_v55  ;;  %v3410_v46 = vmul.f32 %v3329_v30, %v3329_v30 }
 0x283   : > { %v4121_v42 = vpop.f32.mrb[28].mxu1  ;;  %v3363_v18 = vadd.f32 %v3362_v27, %v3327_v19  ;;  %v3408_v36 = vmul.f32 %v3327_v19, %v3327_v19  ;;  %v3442_v25 = vadd.f32 %v3441_v26, %v3407_v10  ;;  %v3328_v13 = vmul.f32 %v4304_v47, %v6010_v6  ;;  %v3285_v11 = vpop.permute.xlu1 %3284 }
 0x284   : > { %v1812_v35 = vpop.f32.mrb[29].mxu1  ;;  %v3411_v14 = vmul.f32 %v3330_v60, %v3330_v60  ;;  %v3290_v27 = vpop.permute.xlu0 %3289 }
 0x285   : > { %v4122_v48 = vpop.f32.mrb[30].mxu1  ;;  %v3443_v33 = vadd.f32 %v3442_v25, %v3408_v36  ;;  %v3364_v63 = vadd.f32 %v3363_v18, %v3328_v13  ;;  %v3409_v15 = vmul.f32 %v3328_v13, %v3328_v13  ;;  %v4269_v17 = vpop.f32.mrb[24].mxu0 }
 0x286   : > { %v1815_v39 = vpop.f32.mrb[31].mxu1  ;;  %v4305_v4 = vadd.f32 %v4269_v17, %v4117_v8  ;;  %v3008_v49 = vpop.f32.mrb[25].mxu0 }
 0x287   : > { %v3365_v28 = vadd.f32 %v3364_v63, %v3329_v30  ;;  %v3444_v34 = vadd.f32 %v3443_v33, %v3409_v15  ;;  %v4306_v37 = vadd.f32 %v3008_v49, %v1796_v12  ;;  %v4270_v52 = vpop.f32.mrb[26].mxu0 }
 0x288   : > { %v4307_v41 = vadd.f32 %v4270_v52, %v4118_v32  ;;  %v3011_v6 = vpop.f32.mrb[27].mxu0  ;;  %v3333_v5 = vmul.f32 %v4305_v4, %v3260_v9 }
 0x289   : > { %v3445_v53 = vadd.f32 %v3444_v34, %v3410_v46  ;;  %v3331_v61 = vmul.f32 %v4306_v37, %v3250_v2  ;;  %v3366_v55 = vadd.f32 %v3365_v28, %v3330_v60  ;;  %v4308_v7 = vadd.f32 %v3011_v6, %v1799_v21  ;;  %v3295_v60 = vpop.permute.xlu1 %3294  ;;  %v3300_v28 = vpop.permute.xlu0 %3299 }
 0x28a   : > { %v3334_v29 = vmul.f32 %v4307_v41, %v3265_v38  ;;  %v3414_v24 = vmul.f32 %v3333_v5, %v3333_v5 }
 0x28b   : > { %v4125_v50 = vpop.f32.mrb[32].mxu1  ;;  %v3367_v0 = vadd.f32 %v3366_v55, %v3331_v61  ;;  %v3412_v57 = vmul.f32 %v3331_v61, %v3331_v61  ;;  %v3446_v40 = vadd.f32 %v3445_v53, %v3411_v14  ;;  %v3332_v8 = vmul.f32 %v4308_v7, %v3255_v43 }
 0x28c   : > { %v1828_v1 = vpop.f32.mrb[33].mxu1  ;;  %v3415_v22 = vmul.f32 %v3334_v29, %v3334_v29 }
 0x28d   : > { %v4126_v56 = vpop.f32.mrb[34].mxu1  ;;  %v3447_v12 = vadd.f32 %v3446_v40, %v3412_v57  ;;  %v3368_v59 = vadd.f32 %v3367_v0, %v3332_v8  ;;  %v3413_v51 = vmul.f32 %v3332_v8, %v3332_v8  ;;  %v4273_v32 = vpop.f32.mrb[28].mxu0 }
 0x28e   : > { %v1831_v23 = vpop.f32.mrb[35].mxu1  ;;  %v4309_v62 = vadd.f32 %v4273_v32, %v4121_v42  ;;  %v3024_v2 = vpop.f32.mrb[29].mxu0 }
 0x28f   : > { %v3369_v21 = vadd.f32 %v3368_v59, %v3333_v5  ;;  %v3448_v3 = vadd.f32 %v3447_v12, %v3413_v51  ;;  %v4310_v45 = vadd.f32 %v3024_v2, %v1812_v35  ;;  %v4274_v20 = vpop.f32.mrb[30].mxu0  ;;  %v3305_v7 = vpop.permute.xlu1 %3304 }
 0x290   : > { %v4311_v9 = vadd.f32 %v4274_v20, %v4122_v48  ;;  %v3027_v43 = vpop.f32.mrb[31].mxu0  ;;  %v3337_v19 = vmul.f32 %v4309_v62, %v3280_v58 }
 0x291   : > { %v3449_v10 = vadd.f32 %v3448_v3, %v3414_v24  ;;  %v3335_v31 = vmul.f32 %v4310_v45, %v3270_v16  ;;  %v3370_v44 = vadd.f32 %v3369_v21, %v3334_v29  ;;  %v4312_v26 = vadd.f32 %v3027_v43, %v1815_v39  ;;  %v3343_v3 = vld [vmem:[#allocation8] sm:$0x1] }
 0x292   : > { %v3338_v36 = vmul.f32 %v4311_v9, %v3285_v11  ;;  %v3418_v48 = vmul.f32 %v3337_v19, %v3337_v19  ;;  %v3387_v11 = vld [vmem:[#allocation9] sm:$0x1] }
 0x293   : > { %v3371_v47 = vadd.f32 %v3370_v44, %v3335_v31  ;;  %v3416_v30 = vmul.f32 %v3335_v31, %v3335_v31  ;;  %v3450_v18 = vadd.f32 %v3449_v10, %v3415_v22  ;;  %v3336_v42 = vmul.f32 %v4312_v26, %v3275_v54 }
 0x294   : > { %v3419_v39 = vmul.f32 %v3338_v36, %v3338_v36 }
 0x295   : > { %v3451_v25 = vadd.f32 %v3450_v18, %v3416_v30  ;;  %v3372_v13 = vadd.f32 %v3371_v47, %v3336_v42  ;;  %v3417_v38 = vmul.f32 %v3336_v42, %v3336_v42  ;;  %v4277_v35 = vpop.f32.mrb[32].mxu0 }
 0x296   : > { %v4313_v33 = vadd.f32 %v4277_v35, %v4125_v50  ;;  %v3040_v63 = vpop.f32.mrb[33].mxu0 }
 0x297   : > { %v3373_v15 = vadd.f32 %v3372_v13, %v3337_v19  ;;  %v3452_v17 = vadd.f32 %v3451_v25, %v3417_v38  ;;  %v4314_v16 = vadd.f32 %v3040_v63, %v1828_v1  ;;  %v4278_v4 = vpop.f32.mrb[34].mxu0 }
 0x298   : > { %v4315_v49 = vadd.f32 %v4278_v4, %v4126_v56  ;;  %v3043_v46 = vpop.f32.mrb[35].mxu0  ;;  %v3341_v41 = vmul.f32 %v4313_v33, %v3300_v28 }
 0x299   : > { %v3453_v34 = vadd.f32 %v3452_v17, %v3418_v48  ;;  %v3339_v37 = vmul.f32 %v4314_v16, %v3290_v27  ;;  %v3374_v52 = vadd.f32 %v3373_v15, %v3338_v36  ;;  %v4316_v14 = vadd.f32 %v3043_v46, %v1831_v23 }
 0x29a   : > { %v3342_v5 = vmul.f32 %v4315_v49, %v3305_v7  ;;  %v3422_v57 = vmul.f32 %v3341_v41, %v3341_v41 }
 0x29b   : > { %v3375_v6 = vadd.f32 %v3374_v52, %v3339_v37  ;;  %v3420_v53 = vmul.f32 %v3339_v37, %v3339_v37  ;;  %v3454_v61 = vadd.f32 %v3453_v34, %v3419_v39  ;;  %v3340_v55 = vmul.f32 %v4316_v14, %v3295_v60 }
 0x29c   : > { %v3423_v1 = vmul.f32 %v3342_v5, %v3342_v5 }
 0x29d   : > { %v3455_v54 = vadd.f32 %v3454_v61, %v3420_v53  ;;  %v3376_v50 = vadd.f32 %v3375_v6, %v3340_v55  ;;  %v3421_v0 = vmul.f32 %v3340_v55, %v3340_v55 }
 0x29f   : > { %v3377_v40 = vadd.f32 %v3376_v50, %v3341_v41  ;;  %v3456_v8 = vadd.f32 %v3455_v54, %v3421_v0 }
 0x2a1   : > { %v3378_v58 = vadd.f32 %v3377_v40, %v3342_v5  ;;  %v3457_v29 = vadd.f32 %v3456_v8, %v3422_v57 }
 0x2a3   : > { %v3379_v56 = vrot.slane %v3378_v58, 4  ;;  %v3458_v12 = vadd.f32 %v3457_v29, %v3423_v1 }
 0x2a5   : > { %v3380_v59 = vadd.f32 %v3379_v56, %v3378_v58  ;;  %v3459_v51 = vrot.slane %v3458_v12, 4 }
 0x2a7   : > { %v3381_v32 = vrot.slane %v3380_v59, 2  ;;  %v3460_v23 = vadd.f32 %v3459_v51, %v3458_v12 }
 0x2a9   : > { %v3382_v62 = vadd.f32 %v3381_v32, %v3380_v59  ;;  %v3461_v2 = vrot.slane %v3460_v23, 2 }
 0x2ab   : > { %v3383_v24 = vrot.slane %v3382_v62, 1  ;;  %v3462_v21 = vadd.f32 %v3461_v2, %v3460_v23 }
 0x2ad   : > { %v3384_v45 = vadd.f32 %v3383_v24, %v3382_v62  ;;  %v3463_v20 = vrot.slane %v3462_v21, 1 }
 0x2af   : > { %v3385_v22 = vadd.f32 %v3384_v45, %v3343_v3  ;;  %v3464_v9 = vadd.f32 %v3463_v20, %v3462_v21 }
 0x2b1   : > { %3386 = vst [vmem:[#allocation8] sm:$0x1] %v3385_v22  ;;  %v3465_v43 = vadd.f32 %v3464_v9, %v3387_v11 }
 0x2b2   : > { %4797 = shalt.err (!%p4794_p0)
}
 0x2b3   : > { %s4798_s29 = scalar_lea.hbm %s6093_s3, 16 }
 0x2b4   : > { %p4799_p2 = scmp.ne.s32.totalorder %s6093_s3, %s4798_s29  ;;  %p4804_p3 = scmp.lt.u32.totalorder %s4798_s29, %s6093_s3 }
 0x2b6   : > { %p4800_p11 = pnand %p4799_p2, %p4616_p10 }
 0x2b8   : > { %p4801_p13 = pneg %p4800_p11 }
 0x2ba   : > { %p4806_p8 = pnand %p4804_p3, %p4801_p13 }
 0x2bc   : > { %4809 = shalt.err (!%p4806_p8)
}
 0x2bd   : > { %4593 = dma.vmem_to_hbm [thread:$0]  (%p4616_p10), %s3475_s21, 16, %s6093_s3, [#allocation4]   ;;  %3466 = vst [vmem:[#allocation9] sm:$0x1] %v3465_v43 }
 0x2be   : > { %s4810_s12 = scalar_lea.vmem %s6025_s26, 16  ;;  %s4816_s13 = scalar_lea.vmem %s6025_s26, 32 }
 0x2bf   : > { %p4811_p7 = scmp.ne.s32.totalorder %s6025_s26, %s4810_s12  ;;  %p4817_p4 = scmp.lt.s32.totalorder %s6025_s26, %s6025_s26 }
 0x2c0   : > { %p4818_p5 = scmp.lt.s32.totalorder %s4816_s13, %s4810_s12 }
 0x2c1   : > { %p4812_p9 = pnand %p4811_p7, %p4616_p10 }
 0x2c2   : > { %p4819_p6 = por %p4818_p5, %p4817_p4 }
 0x2c3   : > { %p4813_p1 = pneg %p4812_p9 }
 0x2c5   : > { %p4820_p12 = pnand %p4819_p6, %p4813_p1 }
 0x2c7   : > { %4823 = shalt.err (!%p4820_p12)
}
 0x2c8   : > { %s4824_s22 = scalar_lea.hbm %s6094_s4, 16 }
 0x2c9   : > { %p4825_p0 = scmp.ne.s32.totalorder %s6094_s4, %s4824_s22  ;;  %p4830_p13 = scmp.lt.u32.totalorder %s4824_s22, %s6094_s4 }
 0x2cb   : > { %p4826_p2 = pnand %p4825_p0, %p4616_p10 }
 0x2cd   : > { %p4827_p11 = pneg %p4826_p2 }
 0x2cf   : > { %p4832_p3 = pnand %p4830_p13, %p4827_p11 }
 0x2d1   : > { %4835 = shalt.err (!%p4832_p3)
}
 0x2d2   : > { %4595 = dma.vmem_to_hbm [thread:$0]  (%p4616_p10), %s6025_s26, 16, %s6094_s4, [#allocation10]  }
 0x2d3   : > { %4861 = dma.done.wait (%p4616_p10), [#allocation4], 16  }
 0x2d4   : > { %4863 = vsyncadd (%p4616_p10), [#allocation4], 4294967280 }
 0x2d5   : > { %4865 = dma.done.wait (%p4616_p10), [#allocation10], 16  }
 0x2d6   : > { %4867 = vsyncadd (%p4616_p10), [#allocation10], 4294967280 }
 0x2d7 PF: > { %p18_p8 = scmp.ge.s32.totalorder %s5016_s7, 4   ;;  %s6169_s15 = smov %s4874_s16 }
 0x2d8   : > { %s6170_s16 = smov %s4878_s17  ;;  %s6171_s17 = smov %s5025_s10 }
 0x2d9   : > { %s6172_s18 = smov %s5016_s7  ;;  %20 = sbr.rel (!%p18_p8) target bundleno = 6 (0x6), region = 97 }
 0x2e0   :  { %3502 = vsyncpa [#allocation3], 1 }
 0x2e1   :  { %3504 = vsyncpa [#allocation3 + $0x1], 1 }
 0x2e2   :  { %3505 = vsyncpa [#allocation6], 1 }
 0x2e3   :  { %3506 = vsyncpa [#allocation4], 1 }
 0x2e4   :  { %3508 = vsyncpa [#allocation4 + $0x1], 1 }
 0x2e5   :  { %3509 = vsyncpa [#allocation10], 1 }

</bundles_post_ra>
